<compile_context>
chip_gen: v5e
topology: v5e:2x2
jax: 0.10.0
libtpu: 0.0.40
codegen_flags: <defaults>
</compile_context>

<pallas_src>
import functools
import math

import jax
import jax.numpy as jnp
from jax import lax
from jax.experimental import pallas as pl
from jax.experimental.pallas import tpu as pltpu


# ----------------------------- in-kernel helpers -----------------------------

def _sparsemax_lastdim(z, num_iters):
    """Exact sparsemax along the last axis via bisection on the threshold tau.

    sparsemax(z) = max(z - tau, 0) with tau chosen so the result sums to 1.
    After shifting by max(z) the threshold lies in [-1, 0]; `num_iters`
    bisection steps bound |tau error| by 2**-(num_iters + 1).  Only O(row)
    scratch and VPU/XLU work -- no sort, no [K, K] pairwise tensor.
    """
    z_max = jnp.max(z, axis=-1, keepdims=True)
    y = z - z_max                                     # <= 0 (shift-invariant)
    lo = jnp.full_like(z_max, -1.0)                   # f(-1) >= 0
    hi = jnp.zeros_like(z_max)                        # f(0)   = -1

    def body(_, carry):
        lo, hi = carry
        mid = 0.5 * (lo + hi)
        f_mid = jnp.sum(jnp.maximum(y - mid, 0.0), axis=-1, keepdims=True) - 1.0
        pred = f_mid > 0.0
        return jnp.where(pred, mid, lo), jnp.where(pred, hi, mid)

    lo, hi = lax.fori_loop(0, num_iters, body, (lo, hi))
    tau = 0.5 * (lo + hi)
    return jnp.maximum(y - tau, 0.0)


# --------------------------------- kernels -----------------------------------

def _qkv_rope_kernel(x_ref, w_ref, b_ref, cos_ref, sin_ref,
                     q_ref, k_ref, v_ref, *,
                     num_heads, head_dim, rotary_value, compute_dtype):
    """Fused QKV projection + RoFormer rotary -> head-major q/k/v tiles."""
    hidden = num_heads * head_dim
    x = x_ref[0].astype(compute_dtype)                          # [Tq, H]

    # One NN matmul for Q|K|V; weight is pre-transposed [H, 3H] and the Q third
    # already carries the 1/sqrt(head_dim) scale.  f32 accumulate + f32 bias.
    qkv = jnp.dot(x, w_ref[...], preferred_element_type=jnp.float32)
    qkv = qkv + b_ref[...]                                      # [Tq, 3H] f32

    # RoFormer rotary on interleaved even/odd pairs:
    #   out[2i]   = t[2i]   * cos_i - t[2i+1] * sin_i
    #   out[2i+1] = t[2i+1] * cos_i + t[2i]   * sin_i
    # cos table: cos repeated per pair; sin table: sign-folded (+sin on odd
    # lanes, -sin on even lanes).  Parity masks are built once per step from a
    # broadcasted iota; roll wrap-around lanes are zeroed by those masks.
    cos_t = cos_ref[...]                                        # [Tq, H] f32
    sin_t = sin_ref[...]                                        # [Tq, H] f32
    odd = (lax.broadcasted_iota(jnp.int32, cos_t.shape, 1) % 2).astype(jnp.float32)
    sin_odd = sin_t * odd                 # multiplies roll(t, +1)   (odd lanes)
    sin_even = sin_t * (1.0 - odd)        # multiplies roll(t, -1)   (even lanes)

    def rope(t):
        return (t * cos_t
                + pltpu.roll(t, 1, axis=1) * sin_odd
                + pltpu.roll(t, hidden - 1, axis=1) * sin_even)

    q = rope(qkv[:, :hidden])
    k = rope(qkv[:, hidden:2 * hidden])
    v = qkv[:, 2 * hidden:]
    if rotary_value:
        v = rope(v)

    # Store head-major [nH, Tq, dH] (compute dtype) so the attention kernel
    # needs no in-kernel reshape/transpose; per-head lane slices here are small
    # VMEM copies next to the projection matmul.
    for h in range(num_heads):
        sl = slice(h * head_dim, (h + 1) * head_dim)
        q_ref[0, h] = q[:, sl].astype(q_ref.dtype)
        k_ref[0, h] = k[:, sl].astype(k_ref.dtype)
        v_ref[0, h] = v[:, sl].astype(v_ref.dtype)


def _attention_kernel(*refs, num_heads, head_dim, mask_kind,
                      compute_dtype, sparsemax_iters):
    """Heads-batched scores + additive mask + sparsemax + probs @ V."""
    if mask_kind == "none":
        q_ref, k_ref, v_ref, out_ref = refs
        mask_ref = None
    else:
        q_ref, k_ref, v_ref, mask_ref, out_ref = refs

    q = q_ref[0]                                                # [nH, Tq, dH]
    k = k_ref[0]                                                # [nH, S,  dH]

    # Heads-batched QK^T (batch dim = heads).  Scale already folded into Wq/bq.
    scores = jnp.einsum("hqd,hkd->hqk", q, k,
                        preferred_element_type=jnp.float32)     # [nH, Tq, S] f32

    if mask_kind == "key":
        scores = scores + mask_ref[0]                           # [1, S] broadcast
    elif mask_kind == "full":
        scores = scores + mask_ref[0][None]                     # [1, Tq, S]

    probs = _sparsemax_lastdim(scores, sparsemax_iters)         # f32, rows sum to 1
    # Dropout on attention_probs is identity (inference); head_mask not applied.

    ctx = jnp.einsum("hqk,hkd->hqd", probs.astype(compute_dtype), v_ref[0],
                     preferred_element_type=jnp.float32)        # [nH, Tq, dH] f32

    # Merge heads into the lane-dense [Tq, H] output block; the HBM writeback of
    # the whole block stays an unmasked, 128-multiple-wide store at real sizes.
    for h in range(num_heads):
        out_ref[0, :, h * head_dim:(h + 1) * head_dim] = ctx[h].astype(out_ref.dtype)


# --------------------------------- wrapper ------------------------------------

def _normalize_mask(attention_mask, batch, seq):
    """Normalize the additive mask to None / key-padding [B,1,S] / full [B,S,S]."""
    if attention_mask is None:
        return "none", None
    m = jnp.asarray(attention_mask, jnp.float32)
    if m.ndim == 4:                     # HF extended mask [B,1,1,S] or [B,1,S,S]
        m = m[:, 0]
    if m.ndim == 1:                     # [S]
        m = m[None, None, :]
    elif m.ndim == 2:
        if m.shape == (batch, seq):     # [B, S] key mask
            m = m[:, None, :]
        elif m.shape == (seq, seq):     # [S, S] full mask
            m = m[None]
        else:
            raise ValueError(f"unsupported attention_mask shape {attention_mask.shape}")
    if m.ndim != 3:
        raise ValueError(f"unsupported attention_mask shape {attention_mask.shape}")
    if m.shape[-2] == 1:
        return "key", jnp.broadcast_to(m, (batch, 1, seq))
    return "full", jnp.broadcast_to(m, (batch, seq, seq))


def roformer_self_attention(hidden_states, wq, bq, wk, bk, wv, bv, sin, cos,
                            attention_mask=None, *, num_heads,
                            rotary_value=False, compute_dtype=jnp.bfloat16,
                            query_block=128, sparsemax_iters=25,
                            vmem_limit_bytes=32 * 1024 * 1024):
    """RoFormer self-attention (context_layer output).

    hidden_states: [B, S, H]; wq/wk/wv: [H, H] PyTorch [out, in]; bq/bk/bv: [H];
    sin/cos: [S, H//num_heads//2] (the halves of sinusoidal_pos);
    attention_mask: optional additive mask (None, key-padding, or full).
    """
    B, S, H = hidden_states.shape
    assert H % num_heads == 0
    d_h = H // num_heads
    assert d_h % 2 == 0
    assert sin.shape == (S, d_h // 2) and cos.shape == (S, d_h // 2)
    tq = min(query_block, S)
    assert S % tq == 0, "sequence length must be divisible by the query block"
    n_q = S // tq

    # ---- one-time prep (cheap XLA ops; cache/hoist outside the hot loop) ----
    scale = 1.0 / math.sqrt(d_h)
    w_qkv = jnp.concatenate(
        [(wq.astype(jnp.float32) * scale).T,          # fold score scale into Wq
         wk.astype(jnp.float32).T,
         wv.astype(jnp.float32).T], axis=1).astype(compute_dtype)      # [H, 3H]
    b_qkv = jnp.concatenate(
        [bq.astype(jnp.float32) * scale,
         bk.astype(jnp.float32),
         bv.astype(jnp.float32)]).reshape(1, 3 * H)                    # [1, 3H] f32

    # Rotary tables: one [S, H] cos (pairs repeated, tiled over heads) and one
    # [S, H] sign-folded sin (-sin on even lanes, +sin on odd lanes).
    cos_pair = jnp.repeat(cos.astype(jnp.float32), 2, axis=-1)         # [S, dH]
    sin_pair = jnp.repeat(sin.astype(jnp.float32), 2, axis=-1)
    sign = jnp.where(jnp.arange(d_h) % 2 == 0, -1.0, 1.0)
    cos_t = jnp.tile(cos_pair, (1, num_heads))                         # [S, H]
    sin_t = jnp.tile(sin_pair * sign[None, :], (1, num_heads))         # [S, H]

    mask_kind, mask_arr = _normalize_mask(attention_mask, B, S)

    compiler_params = pltpu.CompilerParams(
        dimension_semantics=("parallel", "parallel"),
        vmem_limit_bytes=vmem_limit_bytes)

    # ---- kernel 1: fused QKV projection + rotary -> head-major q/k/v ----
    qkv_shape = jax.ShapeDtypeStruct((B, num_heads, S, d_h), compute_dtype)
    head_major_spec = pl.BlockSpec((1, num_heads, tq, d_h),
                                   lambda b, i: (b, 0, i, 0))
    const2 = lambda b, i: (0, 0)       # weights / tables stay VMEM-resident

    q, k, v = pl.pallas_call(
        functools.partial(_qkv_rope_kernel, num_heads=num_heads, head_dim=d_h,
                          rotary_value=rotary_value, compute_dtype=compute_dtype),
        out_shape=(qkv_shape, qkv_shape, qkv_shape),
        grid_spec=pltpu.PrefetchScalarGridSpec(
            num_scalar_prefetch=0,
            grid=(B, n_q),
            in_specs=[
                pl.BlockSpec((1, tq, H), lambda b, i: (b, i, 0)),   # hidden_states
                pl.BlockSpec((H, 3 * H), const2),                   # Wqkv [in, 3*out]
                pl.BlockSpec((1, 3 * H), const2),                   # bqkv
                pl.BlockSpec((tq, H), lambda b, i: (i, 0)),         # cos table
                pl.BlockSpec((tq, H), lambda b, i: (i, 0)),         # sin table (signed)
            ],
            out_specs=(head_major_spec, head_major_spec, head_major_spec)),
        compiler_params=compiler_params,
    )(hidden_states, w_qkv, b_qkv, cos_t, sin_t)

    # ---- kernel 2: heads-batched scores + sparsemax + probs @ V ----
    in_specs = [
        pl.BlockSpec((1, num_heads, tq, d_h), lambda b, i: (b, 0, i, 0)),   # q tile
        pl.BlockSpec((1, num_heads, S, d_h), lambda b, i: (b, 0, 0, 0)),    # k (all keys)
        pl.BlockSpec((1, num_heads, S, d_h), lambda b, i: (b, 0, 0, 0)),    # v
    ]
    args = [q, k, v]
    if mask_kind == "key":
        in_specs.append(pl.BlockSpec((1, 1, S), lambda b, i: (b, 0, 0)))
        args.append(mask_arr)
    elif mask_kind == "full":
        in_specs.append(pl.BlockSpec((1, tq, S), lambda b, i: (b, i, 0)))
        args.append(mask_arr)

    return pl.pallas_call(
        functools.partial(_attention_kernel, num_heads=num_heads, head_dim=d_h,
                          mask_kind=mask_kind, compute_dtype=compute_dtype,
                          sparsemax_iters=sparsemax_iters),
        out_shape=jax.ShapeDtypeStruct((B, S, H), hidden_states.dtype),
        grid_spec=pltpu.PrefetchScalarGridSpec(
            num_scalar_prefetch=0,
            grid=(B, n_q),
            in_specs=in_specs,
            out_specs=pl.BlockSpec((1, tq, H), lambda b, i: (b, i, 0))),
        compiler_params=compiler_params,
    )(*args)


# ----------------------------- pure-JAX reference -----------------------------

def _sparsemax_reference(z):
    """Canonical sort-based sparsemax along the last axis."""
    K = z.shape[-1]
    z_sorted = -jnp.sort(-z, axis=-1)                           # descending
    csum = jnp.cumsum(z_sorted, axis=-1)
    ks = jnp.arange(1, K + 1, dtype=z.dtype)
    support = (1.0 + ks * z_sorted > csum).astype(z.dtype)
    k_z = jnp.sum(support, axis=-1, keepdims=True)
    s_k = jnp.take_along_axis(csum, k_z.astype(jnp.int32) - 1, axis=-1)
    tau = (s_k - 1.0) / k_z
    return jnp.maximum(z - tau, 0.0)


def roformer_self_attention_reference(hidden_states, wq, bq, wk, bk, wv, bv,
                                      sin, cos, attention_mask, *, num_heads,
                                      rotary_value=False):
    """f32 JAX mirror of the PyTorch module's standard self-attention path."""
    B, S, H = hidden_states.shape
    d_h = H // num_heads
    x = hidden_states.astype(jnp.float32)
    hp = jax.lax.Precision.HIGHEST

    def lin(w, b):
        return jnp.einsum("bsh,oh->bso", x, w.astype(jnp.float32),
                          precision=hp) + b.astype(jnp.float32)

    def split(t):  # transpose_for_scores
        return t.reshape(B, S, num_heads, d_h).transpose(0, 2, 1, 3)

    q, k, v = split(lin(wq, bq)), split(lin(wk, bk)), split(lin(wv, bv))

    sin_b = sin.astype(jnp.float32)[None, None]                 # [1,1,S,dH/2]
    cos_b = cos.astype(jnp.float32)[None, None]

    def rope(t):  # PyTorch apply_rotary (interleaved pairs)
        x1, x2 = t[..., 0::2], t[..., 1::2]
        return jnp.stack([x1 * cos_b - x2 * sin_b,
                          x2 * cos_b + x1 * sin_b], axis=-1).reshape(t.shape)

    q, k = rope(q), rope(k)
    if rotary_value:
        v = rope(v)

    scores = jnp.einsum("bhqd,bhkd->bhqk", q, k, precision=hp) / math.sqrt(d_h)
    if attention_mask is not None:
        m = jnp.asarray(attention_mask, jnp.float32)
        if m.ndim == 3:
            m = m[:, None]                                      # broadcast over heads
        scores = scores + m
    probs = _sparsemax_reference(scores)
    ctx = jnp.einsum("bhqk,bhkd->bhqd", probs, v, precision=hp)
    return ctx.transpose(0, 2, 1, 3).reshape(B, S, H).astype(hidden_states.dtype)


# ------------------------------------ test ------------------------------------

if __name__ == "__main__":
    B, S, H, NUM_HEADS = 2, 64, 128, 4
    DH = H // NUM_HEADS                                         # 32

    key = jax.random.PRNGKey(0)
    ks = jax.random.split(key, 4)

    hidden_states = jax.random.normal(ks[0], (B, S, H), dtype=jnp.float32)

    def linear_init(k, out_f, in_f):
        kw, kb = jax.random.split(k)
        w = jax.random.normal(kw, (out_f, in_f), dtype=jnp.float32) * 0.05
        b = jax.random.normal(kb, (out_f,), dtype=jnp.float32) * 0.05
        return w, b

    wq, bq = linear_init(ks[1], H, H)
    wk, bk = linear_init(ks[2], H, H)
    wv, bv = linear_init(ks[3], H, H)

    # RoFormer sinusoidal position tables (sin/cos halves of sinusoidal_pos).
    pos = jnp.arange(S, dtype=jnp.float32)[:, None]
    inv_freq = 1.0 / (10000.0 ** (jnp.arange(0, DH, 2, dtype=jnp.float32) / DH))
    angles = pos * inv_freq[None, :]                            # [S, DH//2]
    sin_tab, cos_tab = jnp.sin(angles), jnp.cos(angles)

    # Additive key-padding mask: batch 1 has its last 9 key positions padded out.
    valid_len = jnp.array([S, S - 9], dtype=jnp.int32)
    key_ok = (jnp.arange(S)[None, :] < valid_len[:, None]).astype(jnp.float32)
    attention_mask = ((1.0 - key_ok) * -1e4)[:, None, :]        # [B, 1, S]

    run = functools.partial(roformer_self_attention, num_heads=NUM_HEADS,
                            query_block=32)
    ref = functools.partial(roformer_self_attention_reference, num_heads=NUM_HEADS)

    # 1) exact-parity path (f32 compute) with a key-padding mask.
    out_f32 = run(hidden_states, wq, bq, wk, bk, wv, bv, sin_tab, cos_tab,
                  attention_mask, compute_dtype=jnp.float32)
    jax.block_until_ready(out_f32)
    ref_mask = ref(hidden_states, wq, bq, wk, bk, wv, bv, sin_tab, cos_tab,
                   attention_mask)
    assert out_f32.shape == (B, S, H)
    err = jnp.max(jnp.abs(out_f32 - ref_mask))
    assert jnp.allclose(out_f32, ref_mask, atol=2e-3, rtol=2e-3), (
        f"f32 mismatch vs reference, max abs err = {err}")

    # 2) production path (bf16 MXU operands, f32 accumulation / rope / sparsemax).
    out_bf16 = run(hidden_states, wq, bq, wk, bk, wv, bv, sin_tab, cos_tab,
                   attention_mask, compute_dtype=jnp.bfloat16)
    jax.block_until_ready(out_bf16)
    err = jnp.max(jnp.abs(out_bf16 - ref_mask))
    assert jnp.allclose(out_bf16, ref_mask, atol=8e-2, rtol=5e-2), (
        f"bf16 mismatch vs reference, max abs err = {err}")

    # 3) no-mask specialization + rotary_value=True path (f32).
    out_rv = run(hidden_states, wq, bq, wk, bk, wv, bv, sin_tab, cos_tab,
                 None, compute_dtype=jnp.float32, rotary_value=True)
    jax.block_until_ready(out_rv)
    ref_rv = ref(hidden_states, wq, bq, wk, bk, wv, bv, sin_tab, cos_tab, None,
                 rotary_value=True)
    err = jnp.max(jnp.abs(out_rv - ref_rv))
    assert jnp.allclose(out_rv, ref_rv, atol=2e-3, rtol=2e-3), (
        f"rotary_value mismatch vs reference, max abs err = {err}")

    print("KERNEL_OK")
</pallas_src>

<mosaic_0001>
module attributes {stable_mosaic.version = 11 : i64} {
  func.func @_qkv_rope_kernel(%arg0: i32, %arg1: i32, %arg2: memref<1x32x128xf32, #tpu.memory_space<vmem>>, %arg3: memref<128x384xf32, #tpu.memory_space<vmem>>, %arg4: memref<1x384xf32, #tpu.memory_space<vmem>>, %arg5: memref<32x128xf32, #tpu.memory_space<vmem>>, %arg6: memref<32x128xf32, #tpu.memory_space<vmem>>, %arg7: memref<1x4x32x32xf32, #tpu.memory_space<vmem>>, %arg8: memref<1x4x32x32xf32, #tpu.memory_space<vmem>>, %arg9: memref<1x4x32x32xf32, #tpu.memory_space<vmem>>) attributes {dimension_semantics = [#tpu.dimension_semantics<parallel>, #tpu.dimension_semantics<parallel>], iteration_bounds = array<i64: 2, 2>, scalar_prefetch = 0 : i64, scratch_operands = 0 : i64, tpu.core_type = #tpu.core_type<tc>, window_params = [{transform_indices = @transform_0, window_bounds = array<i64: 1, 32, 128>}, {pipeline_mode = #tpu.pipeline_mode<synchronous>, transform_indices = @transform_1, window_bounds = array<i64: 128, 384>}, {pipeline_mode = #tpu.pipeline_mode<synchronous>, transform_indices = @transform_2, window_bounds = array<i64: 1, 384>}, {transform_indices = @transform_3, window_bounds = array<i64: 32, 128>}, {transform_indices = @transform_4, window_bounds = array<i64: 32, 128>}, {transform_indices = @transform_5, window_bounds = array<i64: 1, 4, 32, 32>}, {transform_indices = @transform_6, window_bounds = array<i64: 1, 4, 32, 32>}, {transform_indices = @transform_7, window_bounds = array<i64: 1, 4, 32, 32>}]} {
    %c0 = arith.constant 0 : index
    %c0_0 = arith.constant 0 : index
    %c0_1 = arith.constant 0 : index
    %0 = vector.load %arg2[%c0, %c0_0, %c0_1] : memref<1x32x128xf32, #tpu.memory_space<vmem>>, vector<1x32x128xf32>
    %1 = vector.shape_cast %0 : vector<1x32x128xf32> to vector<32x128xf32>
    %c0_2 = arith.constant 0 : index
    %c0_3 = arith.constant 0 : index
    %2 = vector.load %arg3[%c0_2, %c0_3] : memref<128x384xf32, #tpu.memory_space<vmem>>, vector<128x384xf32>
    %cst = arith.constant dense<0.000000e+00> : vector<32x384xf32>
    %3 = tpu.matmul %1, %2, %cst {dimension_numbers = #tpu.dot_dimension_numbers<[1], [0], [0], [1], [0, 0, 1, 1], [], []>} : vector<32x128xf32>, vector<128x384xf32>, vector<32x384xf32> -> vector<32x384xf32>
    %c0_4 = arith.constant 0 : index
    %c0_5 = arith.constant 0 : index
    %4 = vector.load %arg4[%c0_4, %c0_5] : memref<1x384xf32, #tpu.memory_space<vmem>>, vector<1x384xf32>
    %5 = vector.broadcast %4 : vector<1x384xf32> to vector<32x384xf32>
    %6 = arith.addf %3, %5 : vector<32x384xf32>
    %c0_6 = arith.constant 0 : index
    %c0_7 = arith.constant 0 : index
    %7 = vector.load %arg5[%c0_6, %c0_7] : memref<32x128xf32, #tpu.memory_space<vmem>>, vector<32x128xf32>
    %c0_8 = arith.constant 0 : index
    %c0_9 = arith.constant 0 : index
    %8 = vector.load %arg6[%c0_8, %c0_9] : memref<32x128xf32, #tpu.memory_space<vmem>>, vector<32x128xf32>
    %9 = tpu.iota {dimensions = array<i32: 1>} : vector<32x128xi32>
    %c2_i32 = arith.constant 2 : i32
    %c0_i32 = arith.constant 0 : i32
    %10 = arith.cmpi eq, %c2_i32, %c0_i32 : i32
    %c1_i32 = arith.constant 1 : i32
    %11 = arith.select %10, %c1_i32, %c2_i32 : i32
    %12 = vector.broadcast %11 : i32 to vector<32x128xi32>
    %13 = arith.remsi %9, %12 : vector<32x128xi32>
    %c0_i32_10 = arith.constant 0 : i32
    %14 = vector.broadcast %c0_i32_10 : i32 to vector<32x128xi32>
    %15 = arith.cmpi ne, %13, %14 : vector<32x128xi32>
    %c0_i32_11 = arith.constant 0 : i32
    %16 = vector.broadcast %c0_i32_11 : i32 to vector<32x128xi32>
    %17 = arith.cmpi slt, %13, %16 : vector<32x128xi32>
    %c0_i32_12 = arith.constant 0 : i32
    %18 = arith.cmpi slt, %11, %c0_i32_12 : i32
    %19 = vector.broadcast %18 : i1 to vector<32x128xi1>
    %20 = vector.broadcast %19 : vector<32x128xi1> to vector<32x128xi1>
    %21 = arith.xori %17, %20 : vector<32x128xi1>
    %22 = arith.andi %21, %15 : vector<32x128xi1>
    %23 = vector.broadcast %11 : i32 to vector<32x128xi32>
    %24 = arith.addi %13, %23 : vector<32x128xi32>
    %25 = arith.select %22, %24, %13 : vector<32x128xi1>, vector<32x128xi32>
    %26 = arith.sitofp %25 : vector<32x128xi32> to vector<32x128xf32>
    %27 = arith.mulf %8, %26 : vector<32x128xf32>
    %cst_13 = arith.constant 1.000000e+00 : f32
    %28 = vector.broadcast %cst_13 : f32 to vector<32x128xf32>
    %29 = arith.subf %28, %26 : vector<32x128xf32>
    %30 = arith.mulf %8, %29 : vector<32x128xf32>
    %31 = vector.extract_strided_slice %6 {offsets = [0, 0], sizes = [32, 128], strides = [1, 1]} : vector<32x384xf32> to vector<32x128xf32>
    %32 = arith.mulf %31, %7 : vector<32x128xf32>
    %c1_i32_14 = arith.constant 1 : i32
    %33 = tpu.dynamic_rotate %31 by %c1_i32_14 dim 1 : vector<32x128xf32>, i32 -> vector<32x128xf32>
    %34 = arith.mulf %33, %27 : vector<32x128xf32>
    %35 = arith.addf %32, %34 : vector<32x128xf32>
    %c127_i32 = arith.constant 127 : i32
    %36 = tpu.dynamic_rotate %31 by %c127_i32 dim 1 : vector<32x128xf32>, i32 -> vector<32x128xf32>
    %37 = arith.mulf %36, %30 : vector<32x128xf32>
    %38 = arith.addf %35, %37 : vector<32x128xf32>
    %39 = vector.extract_strided_slice %6 {offsets = [0, 128], sizes = [32, 128], strides = [1, 1]} : vector<32x384xf32> to vector<32x128xf32>
    %40 = arith.mulf %39, %7 : vector<32x128xf32>
    %c1_i32_15 = arith.constant 1 : i32
    %41 = tpu.dynamic_rotate %39 by %c1_i32_15 dim 1 : vector<32x128xf32>, i32 -> vector<32x128xf32>
    %42 = arith.mulf %41, %27 : vector<32x128xf32>
    %43 = arith.addf %40, %42 : vector<32x128xf32>
    %c127_i32_16 = arith.constant 127 : i32
    %44 = tpu.dynamic_rotate %39 by %c127_i32_16 dim 1 : vector<32x128xf32>, i32 -> vector<32x128xf32>
    %45 = arith.mulf %44, %30 : vector<32x128xf32>
    %46 = arith.addf %43, %45 : vector<32x128xf32>
    %47 = vector.extract_strided_slice %6 {offsets = [0, 256], sizes = [32, 128], strides = [1, 1]} : vector<32x384xf32> to vector<32x128xf32>
    %48 = vector.extract_strided_slice %38 {offsets = [0, 0], sizes = [32, 32], strides = [1, 1]} : vector<32x128xf32> to vector<32x32xf32>
    %c0_17 = arith.constant 0 : index
    %c0_18 = arith.constant 0 : index
    %c0_19 = arith.constant 0 : index
    %c0_20 = arith.constant 0 : index
    %49 = vector.load %arg7[%c0_17, %c0_18, %c0_19, %c0_20] : memref<1x4x32x32xf32, #tpu.memory_space<vmem>>, vector<1x1x32x32xf32>
    %50 = vector.shape_cast %49 : vector<1x1x32x32xf32> to vector<32x32xf32>
    %51 = vector.shape_cast %48 : vector<32x32xf32> to vector<1x1x32x32xf32>
    tpu.vector_store %arg7[%c0_17, %c0_18, %c0_19, %c0_20], %51 {strides = array<i32>} : memref<1x4x32x32xf32, #tpu.memory_space<vmem>>, vector<1x1x32x32xf32>,
    %52 = vector.extract_strided_slice %46 {offsets = [0, 0], sizes = [32, 32], strides = [1, 1]} : vector<32x128xf32> to vector<32x32xf32>
    %c0_21 = arith.constant 0 : index
    %c0_22 = arith.constant 0 : index
    %c0_23 = arith.constant 0 : index
    %c0_24 = arith.constant 0 : index
    %53 = vector.load %arg8[%c0_21, %c0_22, %c0_23, %c0_24] : memref<1x4x32x32xf32, #tpu.memory_space<vmem>>, vector<1x1x32x32xf32>
    %54 = vector.shape_cast %53 : vector<1x1x32x32xf32> to vector<32x32xf32>
    %55 = vector.shape_cast %52 : vector<32x32xf32> to vector<1x1x32x32xf32>
    tpu.vector_store %arg8[%c0_21, %c0_22, %c0_23, %c0_24], %55 {strides = array<i32>} : memref<1x4x32x32xf32, #tpu.memory_space<vmem>>, vector<1x1x32x32xf32>,
    %56 = vector.extract_strided_slice %47 {offsets = [0, 0], sizes = [32, 32], strides = [1, 1]} : vector<32x128xf32> to vector<32x32xf32>
    %c0_25 = arith.constant 0 : index
    %c0_26 = arith.constant 0 : index
    %c0_27 = arith.constant 0 : index
    %c0_28 = arith.constant 0 : index
    %57 = vector.load %arg9[%c0_25, %c0_26, %c0_27, %c0_28] : memref<1x4x32x32xf32, #tpu.memory_space<vmem>>, vector<1x1x32x32xf32>
    %58 = vector.shape_cast %57 : vector<1x1x32x32xf32> to vector<32x32xf32>
    %59 = vector.shape_cast %56 : vector<32x32xf32> to vector<1x1x32x32xf32>
    tpu.vector_store %arg9[%c0_25, %c0_26, %c0_27, %c0_28], %59 {strides = array<i32>} : memref<1x4x32x32xf32, #tpu.memory_space<vmem>>, vector<1x1x32x32xf32>,
    %60 = vector.extract_strided_slice %38 {offsets = [0, 32], sizes = [32, 32], strides = [1, 1]} : vector<32x128xf32> to vector<32x32xf32>
    %c0_29 = arith.constant 0 : index
    %c1 = arith.constant 1 : index
    %c0_30 = arith.constant 0 : index
    %c0_31 = arith.constant 0 : index
    %61 = vector.load %arg7[%c0_29, %c1, %c0_30, %c0_31] : memref<1x4x32x32xf32, #tpu.memory_space<vmem>>, vector<1x1x32x32xf32>
    %62 = vector.shape_cast %61 : vector<1x1x32x32xf32> to vector<32x32xf32>
    %63 = vector.shape_cast %60 : vector<32x32xf32> to vector<1x1x32x32xf32>
    tpu.vector_store %arg7[%c0_29, %c1, %c0_30, %c0_31], %63 {strides = array<i32>} : memref<1x4x32x32xf32, #tpu.memory_space<vmem>>, vector<1x1x32x32xf32>,
    %64 = vector.extract_strided_slice %46 {offsets = [0, 32], sizes = [32, 32], strides = [1, 1]} : vector<32x128xf32> to vector<32x32xf32>
    %c0_32 = arith.constant 0 : index
    %c1_33 = arith.constant 1 : index
    %c0_34 = arith.constant 0 : index
    %c0_35 = arith.constant 0 : index
    %65 = vector.load %arg8[%c0_32, %c1_33, %c0_34, %c0_35] : memref<1x4x32x32xf32, #tpu.memory_space<vmem>>, vector<1x1x32x32xf32>
    %66 = vector.shape_cast %65 : vector<1x1x32x32xf32> to vector<32x32xf32>
    %67 = vector.shape_cast %64 : vector<32x32xf32> to vector<1x1x32x32xf32>
    tpu.vector_store %arg8[%c0_32, %c1_33, %c0_34, %c0_35], %67 {strides = array<i32>} : memref<1x4x32x32xf32, #tpu.memory_space<vmem>>, vector<1x1x32x32xf32>,
    %68 = vector.extract_strided_slice %47 {offsets = [0, 32], sizes = [32, 32], strides = [1, 1]} : vector<32x128xf32> to vector<32x32xf32>
    %c0_36 = arith.constant 0 : index
    %c1_37 = arith.constant 1 : index
    %c0_38 = arith.constant 0 : index
    %c0_39 = arith.constant 0 : index
    %69 = vector.load %arg9[%c0_36, %c1_37, %c0_38, %c0_39] : memref<1x4x32x32xf32, #tpu.memory_space<vmem>>, vector<1x1x32x32xf32>
    %70 = vector.shape_cast %69 : vector<1x1x32x32xf32> to vector<32x32xf32>
    %71 = vector.shape_cast %68 : vector<32x32xf32> to vector<1x1x32x32xf32>
    tpu.vector_store %arg9[%c0_36, %c1_37, %c0_38, %c0_39], %71 {strides = array<i32>} : memref<1x4x32x32xf32, #tpu.memory_space<vmem>>, vector<1x1x32x32xf32>,
    %72 = vector.extract_strided_slice %38 {offsets = [0, 64], sizes = [32, 32], strides = [1, 1]} : vector<32x128xf32> to vector<32x32xf32>
    %c0_40 = arith.constant 0 : index
    %c2 = arith.constant 2 : index
    %c0_41 = arith.constant 0 : index
    %c0_42 = arith.constant 0 : index
    %73 = vector.load %arg7[%c0_40, %c2, %c0_41, %c0_42] : memref<1x4x32x32xf32, #tpu.memory_space<vmem>>, vector<1x1x32x32xf32>
    %74 = vector.shape_cast %73 : vector<1x1x32x32xf32> to vector<32x32xf32>
    %75 = vector.shape_cast %72 : vector<32x32xf32> to vector<1x1x32x32xf32>
    tpu.vector_store %arg7[%c0_40, %c2, %c0_41, %c0_42], %75 {strides = array<i32>} : memref<1x4x32x32xf32, #tpu.memory_space<vmem>>, vector<1x1x32x32xf32>,
    %76 = vector.extract_strided_slice %46 {offsets = [0, 64], sizes = [32, 32], strides = [1, 1]} : vector<32x128xf32> to vector<32x32xf32>
    %c0_43 = arith.constant 0 : index
    %c2_44 = arith.constant 2 : index
    %c0_45 = arith.constant 0 : index
    %c0_46 = arith.constant 0 : index
    %77 = vector.load %arg8[%c0_43, %c2_44, %c0_45, %c0_46] : memref<1x4x32x32xf32, #tpu.memory_space<vmem>>, vector<1x1x32x32xf32>
    %78 = vector.shape_cast %77 : vector<1x1x32x32xf32> to vector<32x32xf32>
    %79 = vector.shape_cast %76 : vector<32x32xf32> to vector<1x1x32x32xf32>
    tpu.vector_store %arg8[%c0_43, %c2_44, %c0_45, %c0_46], %79 {strides = array<i32>} : memref<1x4x32x32xf32, #tpu.memory_space<vmem>>, vector<1x1x32x32xf32>,
    %80 = vector.extract_strided_slice %47 {offsets = [0, 64], sizes = [32, 32], strides = [1, 1]} : vector<32x128xf32> to vector<32x32xf32>
    %c0_47 = arith.constant 0 : index
    %c2_48 = arith.constant 2 : index
    %c0_49 = arith.constant 0 : index
    %c0_50 = arith.constant 0 : index
    %81 = vector.load %arg9[%c0_47, %c2_48, %c0_49, %c0_50] : memref<1x4x32x32xf32, #tpu.memory_space<vmem>>, vector<1x1x32x32xf32>
    %82 = vector.shape_cast %81 : vector<1x1x32x32xf32> to vector<32x32xf32>
    %83 = vector.shape_cast %80 : vector<32x32xf32> to vector<1x1x32x32xf32>
    tpu.vector_store %arg9[%c0_47, %c2_48, %c0_49, %c0_50], %83 {strides = array<i32>} : memref<1x4x32x32xf32, #tpu.memory_space<vmem>>, vector<1x1x32x32xf32>,
    %84 = vector.extract_strided_slice %38 {offsets = [0, 96], sizes = [32, 32], strides = [1, 1]} : vector<32x128xf32> to vector<32x32xf32>
    %c0_51 = arith.constant 0 : index
    %c3 = arith.constant 3 : index
    %c0_52 = arith.constant 0 : index
    %c0_53 = arith.constant 0 : index
    %85 = vector.load %arg7[%c0_51, %c3, %c0_52, %c0_53] : memref<1x4x32x32xf32, #tpu.memory_space<vmem>>, vector<1x1x32x32xf32>
    %86 = vector.shape_cast %85 : vector<1x1x32x32xf32> to vector<32x32xf32>
    %87 = vector.shape_cast %84 : vector<32x32xf32> to vector<1x1x32x32xf32>
    tpu.vector_store %arg7[%c0_51, %c3, %c0_52, %c0_53], %87 {strides = array<i32>} : memref<1x4x32x32xf32, #tpu.memory_space<vmem>>, vector<1x1x32x32xf32>,
    %88 = vector.extract_strided_slice %46 {offsets = [0, 96], sizes = [32, 32], strides = [1, 1]} : vector<32x128xf32> to vector<32x32xf32>
    %c0_54 = arith.constant 0 : index
    %c3_55 = arith.constant 3 : index
    %c0_56 = arith.constant 0 : index
    %c0_57 = arith.constant 0 : index
    %89 = vector.load %arg8[%c0_54, %c3_55, %c0_56, %c0_57] : memref<1x4x32x32xf32, #tpu.memory_space<vmem>>, vector<1x1x32x32xf32>
    %90 = vector.shape_cast %89 : vector<1x1x32x32xf32> to vector<32x32xf32>
    %91 = vector.shape_cast %88 : vector<32x32xf32> to vector<1x1x32x32xf32>
    tpu.vector_store %arg8[%c0_54, %c3_55, %c0_56, %c0_57], %91 {strides = array<i32>} : memref<1x4x32x32xf32, #tpu.memory_space<vmem>>, vector<1x1x32x32xf32>,
    %92 = vector.extract_strided_slice %47 {offsets = [0, 96], sizes = [32, 32], strides = [1, 1]} : vector<32x128xf32> to vector<32x32xf32>
    %c0_58 = arith.constant 0 : index
    %c3_59 = arith.constant 3 : index
    %c0_60 = arith.constant 0 : index
    %c0_61 = arith.constant 0 : index
    %93 = vector.load %arg9[%c0_58, %c3_59, %c0_60, %c0_61] : memref<1x4x32x32xf32, #tpu.memory_space<vmem>>, vector<1x1x32x32xf32>
    %94 = vector.shape_cast %93 : vector<1x1x32x32xf32> to vector<32x32xf32>
    %95 = vector.shape_cast %92 : vector<32x32xf32> to vector<1x1x32x32xf32>
    tpu.vector_store %arg9[%c0_58, %c3_59, %c0_60, %c0_61], %95 {strides = array<i32>} : memref<1x4x32x32xf32, #tpu.memory_space<vmem>>, vector<1x1x32x32xf32>,
    return
  }
  func.func @transform_0(%arg0: i32, %arg1: i32) -> (i32, i32, i32) {
    %c0_i32 = arith.constant 0 : i32
    %c0_i32_0 = arith.constant 0 : i32
    return %arg0, %arg1, %c0_i32 : i32, i32, i32
  }
  func.func @transform_1(%arg0: i32, %arg1: i32) -> (i32, i32) {
    %c0_i32 = arith.constant 0 : i32
    %c0_i32_0 = arith.constant 0 : i32
    %c0_i32_1 = arith.constant 0 : i32
    return %c0_i32, %c0_i32_0 : i32, i32
  }
  func.func @transform_2(%arg0: i32, %arg1: i32) -> (i32, i32) {
    %c0_i32 = arith.constant 0 : i32
    %c0_i32_0 = arith.constant 0 : i32
    %c0_i32_1 = arith.constant 0 : i32
    return %c0_i32, %c0_i32_0 : i32, i32
  }
  func.func @transform_3(%arg0: i32, %arg1: i32) -> (i32, i32) {
    %c0_i32 = arith.constant 0 : i32
    %c0_i32_0 = arith.constant 0 : i32
    return %arg1, %c0_i32 : i32, i32
  }
  func.func @transform_4(%arg0: i32, %arg1: i32) -> (i32, i32) {
    %c0_i32 = arith.constant 0 : i32
    %c0_i32_0 = arith.constant 0 : i32
    return %arg1, %c0_i32 : i32, i32
  }
  func.func @transform_5(%arg0: i32, %arg1: i32) -> (i32, i32, i32, i32) {
    %c0_i32 = arith.constant 0 : i32
    %c0_i32_0 = arith.constant 0 : i32
    %c0_i32_1 = arith.constant 0 : i32
    return %arg0, %c0_i32, %arg1, %c0_i32_0 : i32, i32, i32, i32
  }
  func.func @transform_6(%arg0: i32, %arg1: i32) -> (i32, i32, i32, i32) {
    %c0_i32 = arith.constant 0 : i32
    %c0_i32_0 = arith.constant 0 : i32
    %c0_i32_1 = arith.constant 0 : i32
    return %arg0, %c0_i32, %arg1, %c0_i32_0 : i32, i32, i32, i32
  }
  func.func @transform_7(%arg0: i32, %arg1: i32) -> (i32, i32, i32, i32) {
    %c0_i32 = arith.constant 0 : i32
    %c0_i32_0 = arith.constant 0 : i32
    %c0_i32_1 = arith.constant 0 : i32
    return %arg0, %c0_i32, %arg1, %c0_i32_0 : i32, i32, i32, i32
  }
}

</mosaic_0001>

<bundles_post_ra>
// kernel: tpu_custom_call.1
= control target key start
LH: loop header
LB: loop body
LE: loop exit
PB: predicated region body
PF: predicated region fallthrough
CT: control target
= control target key end

     0   :  { %s2505_s0 = inlined_call_operand.hbm [shape: f32[2,64,128], index: 0, kind: input, shape index: {}]   ;;  %s2506_s1 = inlined_call_operand.hbm [shape: f32[128,384], index: 1, kind: input, shape index: {}]   ;;  %s2507_s2 = inlined_call_operand.hbm [shape: f32[1,384], index: 2, kind: input, shape index: {}]   ;;  %s2508_s3 = inlined_call_operand.hbm [shape: f32[64,128], index: 3, kind: input, shape index: {}]   ;;  %s2509_s4 = inlined_call_operand.hbm [shape: f32[64,128], index: 4, kind: input, shape index: {}]   ;;  %s2510_s5 = inlined_call_operand.vmem [shape: f32[2,4,64,32], index: 5, kind: output, shape index: {0}]   ;;  %s2511_s6 = inlined_call_operand.vmem [shape: f32[2,4,64,32], index: 6, kind: output, shape index: {1}]   ;;  %s2512_s7 = inlined_call_operand.vmem [shape: f32[2,4,64,32], index: 7, kind: output, shape index: {2}]  }
   0x1   :  { %2524 = sst [smem:[#allocation25_spill]] %s2506_s1 }
   0x2   :  { %2525 = sst [smem:[#allocation26_spill]] %s2507_s2 }
   0x3   :  { %2526 = sst [smem:[#allocation27_spill]] %s2508_s3 }
   0x4   :  { %2527 = sst [smem:[#allocation28_spill]] %s2509_s4 }
   0x5   :  { %2528 = sst [smem:[#allocation29_spill]] %s2510_s5 }
   0x6   :  { %2529 = sst [smem:[#allocation30_spill]] %s2511_s6 }
   0x7   :  { %2530 = sst [smem:[#allocation31_spill]] %s2512_s7 }
   0x8   :  { %13 = vsyncpa [#allocation3], 0 }
   0x9   :  { %15 = vsyncpa [#allocation3 + $0x1], 0 }
   0xa   :  { %16 = vsyncpa [#allocation5], 0 }
   0xb   :  { %17 = vsyncpa [#allocation8], 0 }
   0xc   :  { %19 = vsyncpa [#allocation8 + $0x1], 0  ;;  %s1924_s24 = smov 0   ;;  %s1926_s25 = smov 0  }
   0xd   :  { %s1928_s26 = smov 0   ;;  %s1930_s27 = smov 0  }
   0xe   :  { %s1932_s28 = smov 0   ;;  %s1934_s29 = smov 0  }
   0xf   :  { %s1936_s30 = smov 0   ;;  %s1938_s8 = smov 0  }
  0x10   :  { %s1940_s9 = smov 0   ;;  %s1942_s10 = smov 0  }
  0x11   :  { %s1944_s11 = smov 0  }
  0x12 LB: > { %2531 = sst [smem:[#allocation16_spill]] %s1835_s25  ;;  %s1980_s12 = sadd.s32 4294967295, %s1871_s11   ;;  %s1871_s11 = sphi %s1944_s11, %s25_s11   ;;  %s1867_s10 = sphi %s1942_s10, %s2580_s10   ;;  %s1863_s9 = sphi %s1940_s9, %s2579_s9   ;;  %s1859_s8 = sphi %s1938_s8, %s2578_s8   ;;  %s1855_s30 = sphi %s1936_s30, %s2577_s30   ;;  %s1851_s29 = sphi %s1934_s29, %s2576_s29   ;;  %s1847_s28 = sphi %s1932_s28, %s2575_s28   ;;  %s1843_s27 = sphi %s1930_s27, %s2574_s27   ;;  %s1839_s26 = sphi %s1928_s26, %s2571_s26   ;;  %s1835_s25 = sphi %s1926_s25, %s2570_s25   ;;  %s1831_s24 = sphi %s1924_s24, %s2569_s24  }
  0x13   : > { %2532 = sst [smem:[#allocation17_spill]] %s1839_s26  ;;  %p1397_p0 = scmp.ge.s32.totalorder %s1871_s11, 1 }
  0x14   : > { %2533 = sst [smem:[#allocation18_spill]] %s1855_s30  ;;  %p60_p1 = scmp.eq.s32.totalorder %s1980_s12, 0 }
  0x15   : > { %2534 = sst [smem:[#allocation19_spill]] %s1859_s8  ;;  %p248_p2 = scmp.lt.s32.totalorder %s1871_s11, 5 }
  0x16   : > { %s2535_s1 = sld [smem:[#allocation25_spill]]  ;;  %s1873_s17 = smov [#allocation4]  }
  0x17   : > { %p1988_p3 = pnand %p1397_p0, %p248_p2  ;;  %s261_s18 = sshll.u32 %s1873_s17, 4  ;;  %s262_s18 = int_to_ptr.vmem [resolvable:$true] %s261_s18 }
  0x18   : > { %s1874_s20 = smov 384   ;;  %s1875_s21 = smov 24  }
  0x19   : > { %p1502_p4 = pneg %p1988_p3  ;;  %p179_p6 = scmp.eq.s32.totalorder %s1980_s12, 3 }
  0x1a   : > { %s34_s22 = sadd.s32 1, %s1863_s9  ;;  %p54_p8 = scmp.eq.s32.totalorder %s1871_s11, 0 }
  0x1b   : > { %p1996_p5 = pnand %p1502_p4, %p60_p1  ;;  %p2004_p7 = scmp.ge.s32.totalorder %s34_s22, 2 }
  0x1c   : > { %s259_s15 = sshll.u32 %s2535_s1, 4  ;;  %p121_p9 = scmp.ne.s32.totalorder %s1839_s26, %s1835_s25  ;;  %s260_s15 = int_to_ptr.hbm [resolvable:$true] %s259_s15 }
  0x1d   : > { %1505 = dma.hbm_to_vmem [thread:$0]  (!%p1996_p5), %s260_s15, 6144, %s262_s18, [#allocation5], %s1874_s20, %s1874_s20, %s1875_s21  }
  0x1e   : > { %p127_p10 = scmp.ne.s32.totalorder %s1835_s25, %s1831_s24  ;;  %s2582_s22 = smov (%p2004_p7, %s34_s22), 0 }
  0x1f   : > { %2539 = sst [smem:[#allocation20_spill]] %s2582_s22  ;;  %s114_s13 = sadd.s32 1, %s1839_s26 }
  0x20   : > { %p2020_p11 = por %p127_p10, %p60_p1  ;;  %s2026_s15 = ssub.s32 %s1863_s9, %s2582_s22 }
  0x21   : > { %p2030_p12 = por %p121_p9, %p54_p8  ;;  %p112_p13 = scmp.eq.s32.totalorder %s2026_s15, 0 }
  0x22   : > { %s2540_s14 = scalar_select %p2020_p11, 1, 0 }
  0x23   : > { %p1521_p0 = scmp.lt.s32.totalorder %s1871_s11, 4  ;;  %s311_s18 = sand.u32 1, %s1871_s11  }
  0x24   : > { %2541 = sst [smem:[#allocation21_spill]] %s2540_s14  ;;  %s313_s20 = sand.u32 1, %s1839_s26  }
  0x25   : > { %s2037_s24 = scalar_select %p112_p13, %s1839_s26, %s114_s13  }
  0x26   : > { %s1405_s21 = sshll.u32 %s313_s20, 5  ;;  %s1470_s1 = sshll.u32 %s1863_s9, 5 }
  0x27   : > { %2543 = sst [smem:[#allocation22_spill]] %s2037_s24  ;;  %s315_s8 = scalar_lea.vmem [#allocation7], %s1405_s21 }
  0x28   : > { %s2544_s3 = sld [smem:[#allocation27_spill]]  ;;  %s323_s30 = sshll.u32 %s315_s8, 4  ;;  %s324_s30 = int_to_ptr.vmem [resolvable:$true] %s323_s30 }
  0x29   : > { %p2049_p2 = pnand %p1521_p0, %p2030_p12  ;;  %s2546_s4 = sld [smem:[#allocation28_spill]] }
  0x2a   : > { %s2056_s7 = scalar_lea.sflag [#allocation8], %s311_s18  ;;  %s2516_s8 = smov 128  }
  0x2b   : > { %s2547_s2 = sld [smem:[#allocation26_spill]]  ;;  %p53_p4 = scmp.ne.s32.totalorder %s1851_s29, %s1847_s28 }
  0x2c   : > { %p59_p10 = scmp.ne.s32.totalorder %s1847_s28, %s1843_s27  ;;  %s287_s27 = sand.u32 1, %s1851_s29  }
  0x2d   : > { %p2084_p12 = por %p54_p8, %p53_p4  ;;  %p2090_p13 = por %p179_p6, %p53_p4 }
  0x2e   : > { %s320_s22 = scalar_lea.hbm %s2544_s3, %s1470_s1  ;;  %s1401_s24 = sshll.u32 %s287_s27, 5 }
  0x2f   : > { %s321_s5 = sshll.u32 %s320_s22, 4  ;;  %s342_s20 = scalar_lea.hbm %s2546_s4, %s1470_s1  ;;  %s322_s5 = int_to_ptr.hbm [resolvable:$true] %s321_s5 }
  0x30   : > { %s343_s6 = sshll.u32 %s342_s20, 4  ;;  %s2518_s22 = smov 8   ;;  %s2064_s6 = int_to_ptr.hbm [resolvable:$true] %s343_s6 }
  0x31   : > { %1515 = dma.hbm_to_vmem [thread:$0]  (!%p2049_p2), %s322_s5, 512, %s324_s30, %s2056_s7, %s2516_s8, %s2516_s8, %s2518_s22  }
  0x32   : > { %s337_s1 = scalar_lea.vmem [#allocation9], %s1405_s21  ;;  %s274_s13 = sshll.u32 %s2547_s2, 4  ;;  %s275_s13 = int_to_ptr.hbm [resolvable:$true] %s274_s13 }
  0x33   : > { %s2066_s17 = sshll.u32 %s337_s1, 4  ;;  %s1878_s20 = smov [#allocation6]   ;;  %s346_s17 = int_to_ptr.vmem [resolvable:$true] %s2066_s17 }
  0x34   : > { %s276_s3 = sshll.u32 %s1878_s20, 4  ;;  %s37_s5 = sadd.s32 1, %s1867_s10  ;;  %s277_s3 = int_to_ptr.vmem [resolvable:$true] %s276_s3 }
  0x35   : > { %1508 = dma.hbm_to_vmem [thread:$0]  (!%p1996_p5), %s275_s13, 48, %s277_s3, [#allocation5]  }
  0x36   : > { %s2584_s5 = smov (!%p2004_p7, %s37_s5), %s1867_s10  ;;  %s46_s30 = sadd.s32 1, %s1851_s29 }
  0x37   : > { %p39_p9 = scmp.ge.s32.totalorder %s2584_s5, 2  ;;  %p2098_p5 = por %p60_p1, %p59_p10 }
  0x38   : > { %s2549_s1 = scalar_select %p2090_p13, 1, 0 }
  0x39   : > { %s2586_s5 = smov (%p39_p9, %s2584_s5), 0  ;;  %s1402_s18 = sshll.u32 %s1863_s9, 2 }
  0x3a   : > { %2550 = sst [smem:[#allocation23_spill]] %s2549_s1  ;;  %s41_s19 = ssub.s32 %s1867_s10, %s2586_s5 }
  0x3b   : > { %2551 = sst [smem:[#allocation24_spill]] %s2586_s5  ;;  %s43_s23 = sor.u32 %s2026_s15, %s41_s19 }
  0x3c   : > { %p44_p7 = scmp.eq.s32.totalorder %s43_s23, 0  ;;  %s1403_s13 = sshll.u32 %s1867_s10, 3 }
  0x3d   : > { %s296_s8 = sadd.s32 %s1403_s13, %s1402_s18  ;;  %s291_s22 = scalar_lea.vmem [#allocation2], %s1401_s24 }
  0x3e   : > { %s2109_s20 = scalar_select %p44_p7, %s1851_s29, %s46_s30  }
  0x3f   : > { %s301_s2 = sshll.u32 %s291_s22, 4  ;;  %s1404_s4 = sshll.u32 %s296_s8, 3  ;;  %s302_s2 = int_to_ptr.vmem [resolvable:$true] %s301_s2 }
  0x40   : > { %s298_s25 = scalar_lea.hbm %s2505_s0, %s1404_s4  ;;  %p1510_p6 = pnand %p1521_p0, %p2084_p12 }
  0x41   : > { %s299_s15 = sshll.u32 %s298_s25, 4  ;;  %s288_s19 = scalar_lea.sflag [#allocation3], %s287_s27  ;;  %s300_s15 = int_to_ptr.hbm [resolvable:$true] %s299_s15 }
  0x42   : > { %s2553_s23 = smov 8   ;;  %s2554_s5 = smov 128  }
  0x43   : > { %1512 = dma.hbm_to_vmem [thread:$0]  (!%p1510_p6), %s300_s15, 512, %s302_s2, %s288_s19, %s2554_s5, %s2554_s5, %s2553_s23  }
  0x44   : > { %1518 = dma.hbm_to_vmem [thread:$0]  (!%p2049_p2), %s2064_s6, 512, %s346_s17, %s2056_s7, %s2554_s5, %s2554_s5, %s2553_s23  }
  0x45   : > { %357 = sbr.rel (%p1988_p3) target bundleno = 636 (0x27c), region = 40  ;;  %s2132_s4 = sand.u32 (!%p1988_p3), 1, %s1847_s28  }
  0x46   : > { %s1412_s25 = sshll.u32 (!%p1988_p3), %s2132_s4, 5  ;;  %s360_s26 = scalar_lea.sflag (!%p1988_p3), [#allocation3], %s2132_s4 }
  0x47   : > { %s2136_s8 = scalar_lea.vmem (!%p1988_p3), [#allocation2], %s1412_s25 }
  0x4a   : > { %1818 = dma.done.wait (%p2098_p5), %s360_s26, 512  }
  0x4b   : > { %1820 = vsyncadd (%p2098_p5), %s360_s26, 4294966784 }
  0x4c   : > { %1822 = dma.done.wait (%p60_p1), [#allocation5], 6192  }
  0x4d   : > { %1824 = vsyncadd (%p60_p1), [#allocation5], 4294961104  ;;  %s2555_s2 = sld [smem:[#allocation16_spill]]  ;;  %s379_s14 = sand.u32 1, %s1980_s12  }
  0x4e   : > { %s380_s22 = scalar_lea.sflag [#allocation8], %s379_s14 }
  0x53   : > { %s381_s6 = sand.u32 1, %s2555_s2  }
  0x54   : > { %s2148_s7 = sshll.u32 %s381_s6, 5 }
  0x55   : > { %s2151_s17 = scalar_lea.vmem [#allocation7], %s2148_s7 }
  0x56   : > { %1826 = dma.done.wait (%p2020_p11), %s380_s22, 1024  }
  0x57   : > { %1828 = vsyncadd (%p2020_p11), %s380_s22, 4294966272  ;;  %v497_v0 = vld [vmem:[#allocation4 + $0x168] sm:$0xff]  ;;  %v498_v1 = vld [vmem:[#allocation4 + $0x170] sm:$0xff]  ;;  %s1879_s12 = smov 127   ;;  %s1880_s5 = smov 1   ;;  %vm699_vm0 = vcmask 261120  }
  0x58   : > { %v494_v2 = vld [vmem:[#allocation4 + $0x150] sm:$0xff]  ;;  %508 = vmatpush.msra.mxu0 %v497_v0  ;;  %537 = vmatpush.msra.mxu1 %v498_v1  ;;  %v495_v3 = vld [vmem:[#allocation4 + $0x158] sm:$0xff]  ;;  %v492_v5 = vld [vmem:[#allocation4 + $0x140] sm:$0xff]  ;;  %s2172_s30 = sshll.u32 %s2132_s4, 7  ;;  %s1881_s1 = smov 96  }
  0x59   : > { %1472 = vmatpush.msra.mxu3 %v497_v0  ;;  %v491_v4 = vld [vmem:[#allocation4 + $0x138] sm:$0xff]  ;;  %v488_v6 = vld [vmem:[#allocation4 + $0x120] sm:$0xff]  ;;  %v489_v7 = vld [vmem:[#allocation4 + $0x128] sm:$0xff]  ;;  %s2183_s21 = scalar_lea.vmem [#allocation12], %s2172_s30  ;;  %s1882_s3 = smov 64  }
  0x5a   : > { %509 = vmatpush.msra.mxu0 %v494_v2  ;;  %538 = vmatpush.msra.mxu1 %v495_v3  ;;  %v499_v8 = vld [vmem:[#allocation4 + $0x178] sm:$0xff]  ;;  %v496_v9 = vld [vmem:[#allocation4 + $0x160] sm:$0xff]  ;;  %v485_v10 = vld [vmem:[#allocation4 + $0x108] sm:$0xff]  ;;  %s1883_s27 = smov 32   ;;  %s2244_s24 = scalar_lea.vmem [#allocation9], %s2148_s7 }
  0x5b   : > { %1473 = vmatpush.msra.mxu3 %v494_v2  ;;  %v486_v11 = vld [vmem:[#allocation4 + $0x110] sm:$0xff]  ;;  %566 = vmatpush.msra.mxu2 %v499_v8  ;;  %v493_v12 = vld [vmem:[#allocation4 + $0x148] sm:$0xff]  ;;  %v483_v14 = vld [vmem:[#allocation4 + $0xf8] sm:$0xff]  ;;  %s2261_s18 = scalar_lea.vmem [#allocation10], %s2172_s30  ;;  %s2271_s13 = scalar_lea.vmem [#allocation11], %s2172_s30 }
  0x5c   : > { %510 = vmatpush.msra.mxu0 %v491_v4  ;;  %539 = vmatpush.msra.mxu1 %v492_v5  ;;  %v482_v13 = vld [vmem:[#allocation4 + $0xf0] sm:$0xff]  ;;  %v479_v16 = vld [vmem:[#allocation4 + $0xd8] sm:$0xff]  ;;  %v480_v17 = vld [vmem:[#allocation4 + $0xe0] sm:$0xff]  ;;  %s2558_s19 = sld [smem:[#allocation18_spill]] (%p2090_p13) }
  0x5d   : > { %1474 = vmatpush.msra.mxu3 %v491_v4  ;;  %567 = vmatpush.msra.mxu2 %v496_v9  ;;  %v490_v15 = vld [vmem:[#allocation4 + $0x130] sm:$0xff]  ;;  %v487_v18 = vld [vmem:[#allocation4 + $0x118] sm:$0xff]  ;;  %v476_v19 = vld [vmem:[#allocation4 + $0xc0] sm:$0xff]  ;;  %s2559_s23 = sld [smem:[#allocation19_spill]] (%p2090_p13) }
  0x5e   : > { %511 = vmatpush.msra.mxu0 %v488_v6  ;;  %540 = vmatpush.msra.mxu1 %v489_v7  ;;  %v477_v20 = vld [vmem:[#allocation4 + $0xc8] sm:$0xff]  ;;  %v484_v21 = vld [vmem:[#allocation4 + $0x100] sm:$0xff]  ;;  %v474_v23 = vld [vmem:[#allocation4 + $0xb0] sm:$0xff]  ;;  %s2560_s14 = sld [smem:[#allocation29_spill]] (%p2090_p13) }
  0x5f   : > { %1475 = vmatpush.msra.mxu3 %v488_v6  ;;  %568 = vmatpush.msra.mxu2 %v493_v12  ;;  %v473_v22 = vld [vmem:[#allocation4 + $0xa8] sm:$0xff]  ;;  %v470_v25 = vld [vmem:[#allocation4 + $0x90] sm:$0xff]  ;;  %v471_v26 = vld [vmem:[#allocation4 + $0x98] sm:$0xff] }
  0x60   : > { %512 = vmatpush.msra.mxu0 %v485_v10  ;;  %541 = vmatpush.msra.mxu1 %v486_v11  ;;  %v481_v24 = vld [vmem:[#allocation4 + $0xe8] sm:$0xff]  ;;  %v478_v27 = vld [vmem:[#allocation4 + $0xd0] sm:$0xff]  ;;  %v467_v28 = vld [vmem:[#allocation4 + $0x78] sm:$0xff] }
  0x61   : > { %1476 = vmatpush.msra.mxu3 %v485_v10  ;;  %569 = vmatpush.msra.mxu2 %v490_v15  ;;  %v468_v29 = vld [vmem:[#allocation4 + $0x80] sm:$0xff]  ;;  %v475_v30 = vld [vmem:[#allocation4 + $0xb8] sm:$0xff]  ;;  %v465_v32 = vld [vmem:[#allocation4 + $0x68] sm:$0xff]  ;;  %v603_v15 = vlaneseq }
  0x62   : > { %513 = vmatpush.msra.mxu0 %v482_v13  ;;  %542 = vmatpush.msra.mxu1 %v483_v14  ;;  %v464_v31 = vld [vmem:[#allocation4 + $0x60] sm:$0xff]  ;;  %v461_v34 = vld [vmem:[#allocation4 + $0x48] sm:$0xff]  ;;  %v462_v35 = vld [vmem:[#allocation4 + $0x50] sm:$0xff]  ;;  %s1459_s4 = sshll.u32 (%p2090_p13), %s2558_s19, 2 }
  0x63   : > { %1477 = vmatpush.msra.mxu3 %v482_v13  ;;  %570 = vmatpush.msra.mxu2 %v487_v18  ;;  %v472_v33 = vld [vmem:[#allocation4 + $0xa0] sm:$0xff]  ;;  %v469_v36 = vld [vmem:[#allocation4 + $0x88] sm:$0xff]  ;;  %v458_v37 = vld [vmem:[#allocation4 + $0x30] sm:$0xff]  ;;  %s1460_s25 = sshll.u32 (%p2090_p13), %s2559_s23, 5 }
  0x64   : > { %514 = vmatpush.msra.mxu0 %v479_v16  ;;  %543 = vmatpush.msra.mxu1 %v480_v17  ;;  %v459_v38 = vld [vmem:[#allocation4 + $0x38] sm:$0xff]  ;;  %v466_v39 = vld [vmem:[#allocation4 + $0x70] sm:$0xff]  ;;  %v456_v41 = vld [vmem:[#allocation4 + $0x20] sm:$0xff]  ;;  %s894_s26 = sadd.s32 (%p2090_p13), %s1460_s25, %s1459_s4 }
  0x65   : > { %1478 = vmatpush.msra.mxu3 %v479_v16  ;;  %571 = vmatpush.msra.mxu2 %v484_v21  ;;  %v455_v40 = vld [vmem:[#allocation4 + $0x18] sm:$0xff]  ;;  %v452_v43 = vld [vmem:[#allocation4] sm:$0xff]  ;;  %v453_v44 = vld [vmem:[#allocation4 + $0x8] sm:$0xff]  ;;  %v604_v16 = vand.u32 127, %v603_v15 }
  0x66   : > { %515 = vmatpush.msra.mxu0 %v476_v19  ;;  %544 = vmatpush.msra.mxu1 %v477_v20  ;;  %v463_v42 = vld [vmem:[#allocation4 + $0x58] sm:$0xff]  ;;  %v448_v45 = vld [vmem:[%s2136_s8] sm:$0xff]  ;;  %v449_v47 = vld [vmem:[%s2136_s8 + $0x8] sm:$0xff] }
  0x67   : > { %1479 = vmatpush.msra.mxu3 %v476_v19  ;;  %572 = vmatpush.msra.mxu2 %v481_v24  ;;  %v460_v46 = vld [vmem:[#allocation4 + $0x40] sm:$0xff]  ;;  %v457_v48 = vld [vmem:[#allocation4 + $0x28] sm:$0xff]  ;;  %v454_v49 = vld [vmem:[#allocation4 + $0x10] sm:$0xff]  ;;  %v609_v18 = vand.u32 1, %v604_v16 }
  0x68   : > { %516 = vmatpush.msra.mxu0 %v473_v22  ;;  %545 = vmatpush.msra.mxu1 %v474_v23  ;;  %v450_v50 = vld [vmem:[%s2136_s8 + $0x10] sm:$0xff]  ;;  %v451_v51 = vld [vmem:[%s2136_s8 + $0x18] sm:$0xff]  ;;  %v500_v52 = vld [vmem:[#allocation6] sm:$0x7]  ;;  %s1461_s8 = sshll.u32 (%p2090_p13), %s894_s26, 3 }
  0x69   : > { %1480 = vmatpush.msra.mxu3 %v473_v22  ;;  %573 = vmatpush.msra.mxu2 %v478_v27  ;;  %v502_v53 = vperm.slane %v500_v52, 0  ;;  %v503_v57 = vperm.slane %v500_v52, 1  ;;  %v504_v62 = vperm.slane %v500_v52, 2  ;;  %v2238_v19 = vcvt.s32.f32 %v609_v18  ;;  %v599_v23 = vld [vmem:[%s2244_s24] sm:$0xff]  ;;  %s896_s6 = scalar_lea.vmem (%p2090_p13), %s2560_s14, %s1461_s8 }
  0x6a   : > { %517 = vmatpush.msra.mxu0 %v470_v25  ;;  %546 = vmatpush.msra.mxu1 %v471_v26 }
  0x6b   : > { %1481 = vmatpush.msra.mxu3 %v470_v25  ;;  %574 = vmatpush.msra.mxu2 %v475_v30  ;;  %v2241_v21 = vsub.f32 1.0, %v2238_v19  ;;  %v595_v25 = vld [vmem:[%s2151_s17] sm:$0xff]  ;;  %v618_v27 = vmul.f32 %v2238_v19, %v599_v23 }
  0x6c   : > { %518 = vmatpush.msra.mxu0 %v467_v28  ;;  %547 = vmatpush.msra.mxu1 %v468_v29 }
  0x6d   : > { %1482 = vmatpush.msra.mxu3 %v467_v28  ;;  %575 = vmatpush.msra.mxu2 %v472_v33  ;;  %v623_v26 = vmul.f32 %v2241_v21, %v599_v23 }
  0x6e   : > { %519 = vmatpush.msra.mxu0 %v464_v31  ;;  %548 = vmatpush.msra.mxu1 %v465_v32 }
  0x6f   : > { %1483 = vmatpush.msra.mxu3 %v464_v31  ;;  %576 = vmatpush.msra.mxu2 %v469_v36 }
  0x70   : > { %520 = vmatpush.msra.mxu0 %v461_v34  ;;  %549 = vmatpush.msra.mxu1 %v462_v35 }
  0x71   : > { %1484 = vmatpush.msra.mxu3 %v461_v34  ;;  %577 = vmatpush.msra.mxu2 %v466_v39 }
  0x72   : > { %521 = vmatpush.msra.mxu0 %v458_v37  ;;  %550 = vmatpush.msra.mxu1 %v459_v38 }
  0x73   : > { %1485 = vmatpush.msra.mxu3 %v458_v37  ;;  %578 = vmatpush.msra.mxu2 %v463_v42 }
  0x74   : > { %522 = vmatpush.msra.mxu0 %v455_v40  ;;  %551 = vmatpush.msra.mxu1 %v456_v41 }
  0x75   : > { %1486 = vmatpush.msra.mxu3 %v455_v40  ;;  %579 = vmatpush.msra.mxu2 %v460_v46 }
  0x76   : > { %523 = vmatpush.msra.mxu0 %v452_v43  ;;  %552 = vmatpush.msra.mxu1 %v453_v44 }
  0x77   : > { %524 = vmatmul.f32.vlgmr.msra.gmra.mxu0 %v448_v45  ;;  %553 = vmatmul.f32.vlgmr.msra.gmra.mxu1 %v448_v45 }
  0x78   : > { %1487 = vmatpush.msra.mxu3 %v452_v43  ;;  %580 = vmatpush.msra.mxu2 %v457_v48  ;;  %v600_v43 = vld [vmem:[%s2244_s24 + $0x8] sm:$0xff] }
  0x79   : > { %527 = vmatmul.f32.vlgmr.msra.gmra.mxu3 %v449_v47  ;;  %v619_v44 = vmul.f32 %v2238_v19, %v600_v43  ;;  %v624_v46 = vmul.f32 %v2241_v21, %v600_v43 }
  0x7a   : > { %581 = vmatpush.msra.mxu2 %v454_v49 }
  0x7b   : > { %582 = vmatmul.f32.vlgmr.msra.gmra.mxu2 %v448_v45  ;;  %v596_v45 = vld [vmem:[%s2151_s17 + $0x8] sm:$0xff] }
  0x7f   : > { %556 = vmatmul.f32.gmra.mxu1 %v449_v47 }
  0x81   : > { %530 = vmatmul.f32.gmra.mxu3 %v450_v50 }
  0x83   : > { %585 = vmatmul.f32.gmra.mxu2 %v449_v47 }
  0x87   : > { %559 = vmatmul.f32.gmra.mxu1 %v450_v50 }
  0x89   : > { %533 = vmatmul.f32.gmra.mxu3 %v451_v51 }
  0x8b   : > { %588 = vmatmul.f32.gmra.mxu2 %v450_v50 }
  0x8f   : > { %562 = vmatmul.f32.gmra.mxu1 %v451_v51 }
  0x93   : > { %591 = vmatmul.f32.gmra.mxu2 %v451_v51 }
  0xf4   : > { %v525_v54 = vpop.f32.mrf.mxu0  ;;  %v554_v55 = vpop.f32.mrf.mxu1 }
  0xf5   : > { %v2161_v56 = vadd.f32 %v525_v54, %v502_v53  ;;  %v2167_v58 = vadd.f32 %v554_v55, %v503_v57 }
  0xf7   : > { %647 = vrot.lane.b32.xlu2 %v2161_v56, %s1879_s12  ;;  %631 = vrot.lane.b32.xlu0 %v2161_v56, %s1880_s5  ;;  %v627_v30 = vmul.f32 %v595_v25, %v2161_v56  ;;  %v663_v36 = vmul.f32 %v595_v25, %v2167_v58 }
  0xfc   : > { %v528_v59 = vpop.f32.mrf.mxu3  ;;  %v557_v60 = vpop.f32.mrf.mxu1 }
  0xfd   : > { %v2169_v61 = vadd.f32 %v557_v60, %v503_v57  ;;  %v2180_v1 = vadd.f32 %v528_v59, %v502_v53  ;;  %v601_v59 = vld [vmem:[%s2244_s24 + $0x10] sm:$0xff] }
  0xfe   : > { %v583_v63 = vpop.f32.mrf.mxu2  ;;  %v625_v60 = vmul.f32 %v2241_v21, %v601_v59 }
  0xff   : > { %685 = vrot.lane.b32.xlu1 %v2169_v61, %s1879_s12  ;;  %667 = vrot.lane.b32.xlu2 %v2167_v58, %s1880_s5  ;;  %v584_v0 = vadd.f32 %v583_v63, %v504_v62  ;;  %v628_v50 = vmul.f32 %v596_v45, %v2180_v1  ;;  %v597_v63 = vld [vmem:[%s2151_s17 + $0x10] sm:$0xff] }
 0x100   : > { %683 = vrot.lane.b32.xlu0 %v2167_v58, %s1879_s12 }
 0x101   : > { %708 = vst.msk [vmem:[%s2183_s21] sm:$0xff] %vm699_vm0, %v584_v0 }
 0x104   : > { %v531_v2 = vpop.f32.mrf.mxu3  ;;  %v560_v4 = vpop.f32.mrf.mxu1 }
 0x105   : > { %v2187_v3 = vadd.f32 %v531_v2, %v502_v53  ;;  %v2197_v7 = vadd.f32 %v560_v4, %v503_v57 }
 0x106   : > { %v586_v5 = vpop.f32.mrf.mxu2 }
 0x107   : > { %635 = vrot.lane.b32.xlu1 %v2187_v3, %s1880_s5  ;;  %649 = vrot.lane.b32.xlu2 %v2180_v1, %s1879_s12  ;;  %v2195_v6 = vadd.f32 %v586_v5, %v504_v62 }
 0x108   : > { %633 = vrot.lane.b32.xlu0 %v2180_v1, %s1880_s5  ;;  %v665_v1 = vmul.f32 %v597_v63, %v2197_v7 }
 0x109   : > { %709 = vst.msk [vmem:[%s2183_s21 + $0x8] sm:$0xff] %vm699_vm0, %v2195_v6 }
 0x10c   : > { %v534_v10 = vpop.f32.mrf.mxu3  ;;  %v563_v11 = vpop.f32.mrf.mxu1 }
 0x10d   : > { %v2222_v12 = vadd.f32 %v534_v10, %v502_v53  ;;  %v2224_v13 = vadd.f32 %v563_v11, %v503_v57  ;;  %v602_v11 = vld [vmem:[%s2244_s24 + $0x18] sm:$0xff] }
 0x10e   : > { %v589_v8 = vpop.f32.mrf.mxu2  ;;  %v626_v25 = vmul.f32 %v2241_v21, %v602_v11 }
 0x10f   : > { %760 = vrot.lane.b32.xlu1 %v2195_v6, %s1881_s1  ;;  %687 = vrot.lane.b32.xlu2 %v2197_v7, %s1879_s12  ;;  %v2207_v9 = vadd.f32 %v589_v8, %v504_v62 }
 0x110   : > { %758 = vrot.lane.b32.xlu0 %v584_v0, %s1881_s1 }
 0x111   : > { %710 = vst.msk [vmem:[%s2183_s21 + $0x10] sm:$0xff] %vm699_vm0, %v2207_v9 }
 0x116   : > { %v592_v22 = vpop.f32.mrf.mxu2 }
 0x117   : > { %811 = vrot.lane.b32.xlu1 %v2195_v6, %s1882_s3  ;;  %762 = vrot.lane.b32.xlu2 %v2207_v9, %s1881_s1  ;;  %v2247_v24 = vadd.f32 %v592_v22, %v504_v62  ;;  %v620_v62 = vmul.f32 %v2238_v19, %v601_v59 }
 0x118   : > { %809 = vrot.lane.b32.xlu0 %v584_v0, %s1882_s3 }
 0x119   : > { %711 = vst.msk [vmem:[%s2183_s21 + $0x18] sm:$0xff] %vm699_vm0, %v2247_v24 }
 0x11f   : > { %671 = vrot.lane.b32.xlu1 %v2197_v7, %s1880_s5  ;;  %813 = vrot.lane.b32.xlu2 %v2207_v9, %s1882_s3  ;;  %v664_v7 = vmul.f32 %v596_v45, %v2169_v61 }
 0x120   : > { %860 = vrot.lane.b32.xlu0 %v584_v0, %s1883_s27 }
 0x127   : > { %637 = vrot.lane.b32.xlu1 %v2222_v12, %s1880_s5  ;;  %673 = vrot.lane.b32.xlu2 %v2224_v13, %s1880_s5 }
 0x128   : > { %669 = vrot.lane.b32.xlu0 %v2169_v61, %s1880_s5  ;;  %v629_v61 = vmul.f32 %v597_v63, %v2187_v3 }
 0x12f   : > { %653 = vrot.lane.b32.xlu1 %v2222_v12, %s1879_s12 }
 0x130   : > { %651 = vrot.lane.b32.xlu0 %v2187_v3, %s1879_s12 }
 0x138   : > { %689 = vrot.lane.b32.xlu0 %v2224_v13, %s1879_s12 }
 0x140   : > { %764 = vrot.lane.b32.xlu0 %v2247_v24, %s1881_s1 }
 0x148   : > { %815 = vrot.lane.b32.xlu0 %v2247_v24, %s1882_s3 }
 0x151   : > { %v648_v14 = vpop.permute.xlu2 %647 }
 0x152   : > { %v655_v32 = vmul.f32 %v648_v14, %v623_v26 }
 0x159   : > { %v668_v17 = vpop.permute.xlu2 %667 }
 0x15a   : > { %v675_v35 = vmul.f32 %v668_v17, %v618_v27  ;;  %v621_v17 = vmul.f32 %v2238_v19, %v602_v11 }
 0x15c   : > { %v679_v40 = vadd.f32 %v675_v35, %v663_v36 }
 0x161   : > { %v650_v20 = vpop.permute.xlu2 %649 }
 0x162   : > { %v656_v52 = vmul.f32 %v650_v20, %v624_v46  ;;  %v598_v20 = vld [vmem:[%s2151_s17 + $0x18] sm:$0xff] }
 0x163   : > { %v666_v3 = vmul.f32 %v598_v20, %v2224_v13 }
 0x169   : > { %v688_v28 = vpop.permute.xlu2 %687  ;;  %v632_v29 = vpop.permute.xlu0 %631 }
 0x16a   : > { %v639_v31 = vmul.f32 %v632_v29, %v618_v27  ;;  %v693_v5 = vmul.f32 %v688_v28, %v625_v60  ;;  %v630_v28 = vmul.f32 %v598_v20, %v2222_v12 }
 0x16c   : > { %v643_v33 = vadd.f32 %v639_v31, %v627_v30 }
 0x16e   : > { %v659_v34 = vadd.f32 %v655_v32, %v643_v33 }
 0x170   : > { %700 = vst.msk [vmem:[%s2261_s18] sm:$0xff] %vm699_vm0, %v659_v34  ;;  %716 = vrot.lane.b32.xlu1 %v659_v34, %s1881_s1 }
 0x171   : > { %v686_v37 = vpop.permute.xlu1 %685  ;;  %v763_v38 = vpop.permute.xlu2 %762 }
 0x172   : > { %1430 = vst.msk [vmem:[%s2183_s21 + $0x30] sm:$0xff] %vm699_vm0, %v763_v38  ;;  %v684_v39 = vpop.permute.xlu0 %683  ;;  %v692_v18 = vmul.f32 %v686_v37, %v624_v46 }
 0x173   : > { %v691_v41 = vmul.f32 %v684_v39, %v623_v26 }
 0x175   : > { %v695_v42 = vadd.f32 %v691_v41, %v679_v40 }
 0x177   : > { %704 = vst.msk [vmem:[%s2271_s13] sm:$0xff] %vm699_vm0, %v695_v42  ;;  %737 = vrot.lane.b32.xlu2 %v695_v42, %s1881_s1 }
 0x178   : > { %775 = vrot.lane.b32.xlu1 %v659_v34, %s1882_s3 }
 0x179   : > { %v636_v47 = vpop.permute.xlu1 %635  ;;  %v814_v48 = vpop.permute.xlu2 %813 }
 0x17a   : > { %1442 = vst.msk [vmem:[%s2183_s21 + $0x50] sm:$0xff] %vm699_vm0, %v814_v48  ;;  %v634_v49 = vpop.permute.xlu0 %633  ;;  %v641_v26 = vmul.f32 %v636_v47, %v620_v62 }
 0x17b   : > { %v640_v51 = vmul.f32 %v634_v49, %v619_v44 }
 0x17c   : > { %v645_v31 = vadd.f32 %v641_v26, %v629_v61 }
 0x17d   : > { %v644_v53 = vadd.f32 %v640_v51, %v628_v50 }
 0x17f   : > { %v660_v54 = vadd.f32 %v656_v52, %v644_v53  ;;  %792 = vrot.lane.b32.xlu2 %v695_v42, %s1882_s3 }
 0x180   : > { %826 = vrot.lane.b32.xlu1 %v659_v34, %s1883_s27 }
 0x181   : > { %701 = vst.msk [vmem:[%s2261_s18 + $0x8] sm:$0xff] %vm699_vm0, %v660_v54  ;;  %v761_v55 = vpop.permute.xlu1 %760  ;;  %v674_v33 = vpop.permute.xlu2 %673 }
 0x182   : > { %1429 = vst.msk [vmem:[%s2183_s21 + $0x28] sm:$0xff] %vm699_vm0, %v761_v55  ;;  %v759_v56 = vpop.permute.xlu0 %758  ;;  %v678_v12 = vmul.f32 %v674_v33, %v621_v17 }
 0x183   : > { %1428 = vst.msk [vmem:[%s2183_s21 + $0x20] sm:$0xff] %vm699_vm0, %v759_v56 }
 0x184   : > { %v682_v37 = vadd.f32 %v678_v12, %v666_v3 }
 0x187   : > { %843 = vrot.lane.b32.xlu2 %v695_v42, %s1883_s27 }
 0x189   : > { %v812_v57 = vpop.permute.xlu1 %811 }
 0x18a   : > { %1441 = vst.msk [vmem:[%s2183_s21 + $0x48] sm:$0xff] %vm699_vm0, %v812_v57  ;;  %v810_v58 = vpop.permute.xlu0 %809 }
 0x18b   : > { %1440 = vst.msk [vmem:[%s2183_s21 + $0x40] sm:$0xff] %vm699_vm0, %v810_v58 }
 0x18f   : > { %718 = vrot.lane.b32.xlu2 %v660_v54, %s1881_s1 }
 0x191   : > { %v672_v0 = vpop.permute.xlu1 %671 }
 0x192   : > { %v677_v2 = vmul.f32 %v672_v0, %v620_v62  ;;  %v861_v4 = vpop.permute.xlu0 %860 }
 0x193   : > { %1452 = vst.msk [vmem:[%s2183_s21 + $0x60] sm:$0xff] %vm699_vm0, %v861_v4  ;;  %v957_v4 = vld [vmem:[%s2261_s18 + $0x8] sm:$0xff] (%p2090_p13) }
 0x194   : > { %v681_v8 = vadd.f32 %v677_v2, %v665_v1  ;;  %v955_v2 = vld [vmem:[%s2261_s18] sm:$0xff] (%p2090_p13)  ;;  %958 = vst [vmem:[%s896_s6 + $0x8] sm:$0xff] (%p2090_p13), %v957_v4 }
 0x195   : > { %956 = vst [vmem:[%s896_s6] sm:$0xff] (%p2090_p13), %v955_v2 }
 0x196   : > { %v697_v10 = vadd.f32 %v693_v5, %v681_v8 }
 0x197   : > { %777 = vrot.lane.b32.xlu2 %v660_v54, %s1882_s3 }
 0x198   : > { %706 = vst.msk [vmem:[%s2271_s13 + $0x10] sm:$0xff] %vm699_vm0, %v697_v10  ;;  %741 = vrot.lane.b32.xlu1 %v697_v10, %s1881_s1 }
 0x199   : > { %v638_v14 = vpop.permute.xlu1 %637 }
 0x19a   : > { %v670_v15 = vpop.permute.xlu0 %669  ;;  %v642_v23 = vmul.f32 %v638_v14, %v621_v17 }
 0x19b   : > { %v676_v16 = vmul.f32 %v670_v15, %v619_v44 }
 0x19c   : > { %v646_v29 = vadd.f32 %v642_v23, %v630_v28 }
 0x19d   : > { %v680_v22 = vadd.f32 %v676_v16, %v664_v7 }
 0x19f   : > { %v696_v27 = vadd.f32 %v692_v18, %v680_v22  ;;  %828 = vrot.lane.b32.xlu2 %v660_v54, %s1883_s27 }
 0x1a0   : > { %796 = vrot.lane.b32.xlu1 %v697_v10, %s1882_s3 }
 0x1a1   : > { %705 = vst.msk [vmem:[%s2271_s13 + $0x8] sm:$0xff] %vm699_vm0, %v696_v27  ;;  %739 = vrot.lane.b32.xlu0 %v696_v27, %s1881_s1  ;;  %v654_v19 = vpop.permute.xlu1 %653 }
 0x1a2   : > { %v658_v30 = vmul.f32 %v654_v19, %v626_v25  ;;  %v652_v21 = vpop.permute.xlu0 %651 }
 0x1a3   : > { %v657_v32 = vmul.f32 %v652_v21, %v625_v60 }
 0x1a4   : > { %v662_v34 = vadd.f32 %v658_v30, %v646_v29 }
 0x1a5   : > { %v661_v35 = vadd.f32 %v657_v32, %v645_v31 }
 0x1a6   : > { %703 = vst.msk [vmem:[%s2261_s18 + $0x18] sm:$0xff] %vm699_vm0, %v662_v34 }
 0x1a7   : > { %702 = vst.msk [vmem:[%s2261_s18 + $0x10] sm:$0xff] %vm699_vm0, %v661_v35 }
 0x1a8   : > { %847 = vrot.lane.b32.xlu1 %v697_v10, %s1883_s27 }
 0x1a9   : > { %794 = vrot.lane.b32.xlu0 %v696_v27, %s1882_s3 }
 0x1aa   : > { %v690_v36 = vpop.permute.xlu0 %689 }
 0x1ab   : > { %v694_v38 = vmul.f32 %v690_v36, %v626_v25 }
 0x1ad   : > { %v698_v39 = vadd.f32 %v694_v38, %v682_v37  ;;  %v961_v8 = vld [vmem:[%s2261_s18 + $0x18] sm:$0xff] (%p2090_p13) }
 0x1ae   : > { %v959_v5 = vld [vmem:[%s2261_s18 + $0x10] sm:$0xff] (%p2090_p13)  ;;  %962 = vst [vmem:[%s896_s6 + $0x18] sm:$0xff] (%p2090_p13), %v961_v8 }
 0x1af   : > { %707 = vst.msk [vmem:[%s2271_s13 + $0x18] sm:$0xff] %vm699_vm0, %v698_v39  ;;  %743 = vrot.lane.b32.xlu2 %v698_v39, %s1881_s1 }
 0x1b0   : > { %722 = vrot.lane.b32.xlu1 %v662_v34, %s1881_s1  ;;  %960 = vst [vmem:[%s896_s6 + $0x10] sm:$0xff] (%p2090_p13), %v959_v5 }
 0x1b1   : > { %845 = vrot.lane.b32.xlu0 %v696_v27, %s1883_s27 }
 0x1b2   : > { %v765_v41 = vpop.permute.xlu0 %764 }
 0x1b3   : > { %1431 = vst.msk [vmem:[%s2183_s21 + $0x38] sm:$0xff] %vm699_vm0, %v765_v41 }
 0x1b7   : > { %798 = vrot.lane.b32.xlu2 %v698_v39, %s1882_s3 }
 0x1b8   : > { %781 = vrot.lane.b32.xlu1 %v662_v34, %s1882_s3 }
 0x1b9   : > { %720 = vrot.lane.b32.xlu0 %v661_v35, %s1881_s1 }
 0x1ba   : > { %v816_v42 = vpop.permute.xlu0 %815 }
 0x1bb   : > { %1443 = vst.msk [vmem:[%s2183_s21 + $0x58] sm:$0xff] %vm699_vm0, %v816_v42 }
 0x1bf   : > { %849 = vrot.lane.b32.xlu2 %v698_v39, %s1883_s27 }
 0x1c0   : > { %832 = vrot.lane.b32.xlu1 %v662_v34, %s1883_s27 }
 0x1c1   : > { %779 = vrot.lane.b32.xlu0 %v661_v35, %s1882_s3 }
 0x1c7   : > { %864 = vrot.lane.b32.xlu2 %v2207_v9, %s1883_s27 }
 0x1c8   : > { %862 = vrot.lane.b32.xlu1 %v2195_v6, %s1883_s27 }
 0x1c9   : > { %830 = vrot.lane.b32.xlu0 %v661_v35, %s1883_s27 }
 0x1d1   : > { %v738_v13 = vpop.permute.xlu2 %737  ;;  %866 = vrot.lane.b32.xlu0 %v2247_v24, %s1883_s27 }
 0x1d2   : > { %1424 = vst.msk [vmem:[%s2271_s13 + $0x20] sm:$0xff] %vm699_vm0, %v738_v13 }
 0x1d9   : > { %v793_v40 = vpop.permute.xlu2 %792 }
 0x1da   : > { %1436 = vst.msk [vmem:[%s2271_s13 + $0x40] sm:$0xff] %vm699_vm0, %v793_v40 }
 0x1e1   : > { %v844_v6 = vpop.permute.xlu2 %843 }
 0x1e2   : > { %1448 = vst.msk [vmem:[%s2271_s13 + $0x60] sm:$0xff] %vm699_vm0, %v844_v6  ;;  %v717_v9 = vpop.permute.xlu1 %716 }
 0x1e3   : > { %1420 = vst.msk [vmem:[%s2261_s18 + $0x20] sm:$0xff] %vm699_vm0, %v717_v9 }
 0x1e9   : > { %v719_v24 = vpop.permute.xlu2 %718 }
 0x1ea   : > { %1421 = vst.msk [vmem:[%s2261_s18 + $0x28] sm:$0xff] %vm699_vm0, %v719_v24  ;;  %v776_v43 = vpop.permute.xlu1 %775  ;;  %v963_v10 = vld [vmem:[%s2261_s18 + $0x20] sm:$0xff] (%p2090_p13) }
 0x1eb   : > { %1432 = vst.msk [vmem:[%s2261_s18 + $0x40] sm:$0xff] %vm699_vm0, %v776_v43 }
 0x1ec   : > { %964 = vst [vmem:[%s896_s6 + $0x40] sm:$0xff] (%p2090_p13), %v963_v10 }
 0x1f1   : > { %v778_v44 = vpop.permute.xlu2 %777  ;;  %v965_v11 = vld [vmem:[%s2261_s18 + $0x28] sm:$0xff] (%p2090_p13) }
 0x1f2   : > { %1433 = vst.msk [vmem:[%s2261_s18 + $0x48] sm:$0xff] %vm699_vm0, %v778_v44  ;;  %v827_v45 = vpop.permute.xlu1 %826  ;;  %v971_v7 = vld [vmem:[%s2261_s18 + $0x40] sm:$0xff] (%p2090_p13) }
 0x1f3   : > { %1444 = vst.msk [vmem:[%s2261_s18 + $0x60] sm:$0xff] %vm699_vm0, %v827_v45 }
 0x1f4   : > { %966 = vst [vmem:[%s896_s6 + $0x48] sm:$0xff] (%p2090_p13), %v965_v11 }
 0x1f5   : > { %972 = vst [vmem:[%s896_s6 + $0x80] sm:$0xff] (%p2090_p13), %v971_v7 }
 0x1f9   : > { %v829_v46 = vpop.permute.xlu2 %828  ;;  %v973_v16 = vld [vmem:[%s2261_s18 + $0x48] sm:$0xff] (%p2090_p13) }
 0x1fa   : > { %1445 = vst.msk [vmem:[%s2261_s18 + $0x68] sm:$0xff] %vm699_vm0, %v829_v46  ;;  %v979_v20 = vld [vmem:[%s2261_s18 + $0x60] sm:$0xff] (%p2090_p13) }
 0x1fb   : > { %974 = vst [vmem:[%s896_s6 + $0x88] sm:$0xff] (%p2090_p13), %v973_v16 }
 0x1fc   : > { %980 = vst [vmem:[%s896_s6 + $0xc0] sm:$0xff] (%p2090_p13), %v979_v20 }
 0x201   : > { %v981_v22 = vld [vmem:[%s2261_s18 + $0x68] sm:$0xff] (%p2090_p13) }
 0x202   : > { %982 = vst [vmem:[%s896_s6 + $0xc8] sm:$0xff] (%p2090_p13), %v981_v22 }
 0x209   : > { %v744_v47 = vpop.permute.xlu2 %743 }
 0x20a   : > { %1427 = vst.msk [vmem:[%s2271_s13 + $0x38] sm:$0xff] %vm699_vm0, %v744_v47  ;;  %v742_v48 = vpop.permute.xlu1 %741 }
 0x20b   : > { %1426 = vst.msk [vmem:[%s2271_s13 + $0x30] sm:$0xff] %vm699_vm0, %v742_v48 }
 0x211   : > { %v799_v49 = vpop.permute.xlu2 %798 }
 0x212   : > { %1439 = vst.msk [vmem:[%s2271_s13 + $0x58] sm:$0xff] %vm699_vm0, %v799_v49  ;;  %v797_v50 = vpop.permute.xlu1 %796 }
 0x213   : > { %v740_v51 = vpop.permute.xlu0 %739  ;;  %1438 = vst.msk [vmem:[%s2271_s13 + $0x50] sm:$0xff] %vm699_vm0, %v797_v50 }
 0x214   : > { %1425 = vst.msk [vmem:[%s2271_s13 + $0x28] sm:$0xff] %vm699_vm0, %v740_v51 }
 0x219   : > { %v850_v52 = vpop.permute.xlu2 %849 }
 0x21a   : > { %1451 = vst.msk [vmem:[%s2271_s13 + $0x78] sm:$0xff] %vm699_vm0, %v850_v52  ;;  %v848_v53 = vpop.permute.xlu1 %847 }
 0x21b   : > { %v795_v54 = vpop.permute.xlu0 %794  ;;  %1450 = vst.msk [vmem:[%s2271_s13 + $0x70] sm:$0xff] %vm699_vm0, %v848_v53 }
 0x21c   : > { %1437 = vst.msk [vmem:[%s2271_s13 + $0x48] sm:$0xff] %vm699_vm0, %v795_v54 }
 0x221   : > { %v865_v55 = vpop.permute.xlu2 %864 }
 0x222   : > { %1454 = vst.msk [vmem:[%s2183_s21 + $0x70] sm:$0xff] %vm699_vm0, %v865_v55  ;;  %v723_v56 = vpop.permute.xlu1 %722 }
 0x223   : > { %v846_v57 = vpop.permute.xlu0 %845  ;;  %1423 = vst.msk [vmem:[%s2261_s18 + $0x38] sm:$0xff] %vm699_vm0, %v723_v56 }
 0x224   : > { %1449 = vst.msk [vmem:[%s2271_s13 + $0x68] sm:$0xff] %vm699_vm0, %v846_v57 }
 0x22a   : > { %v782_v58 = vpop.permute.xlu1 %781  ;;  %v969_v15 = vld [vmem:[%s2261_s18 + $0x38] sm:$0xff] (%p2090_p13) }
 0x22b   : > { %v721_v59 = vpop.permute.xlu0 %720  ;;  %1435 = vst.msk [vmem:[%s2261_s18 + $0x58] sm:$0xff] %vm699_vm0, %v782_v58 }
 0x22c   : > { %1422 = vst.msk [vmem:[%s2261_s18 + $0x30] sm:$0xff] %vm699_vm0, %v721_v59 }
 0x22d   : > { %970 = vst [vmem:[%s896_s6 + $0x58] sm:$0xff] (%p2090_p13), %v969_v15 }
 0x232   : > { %v833_v60 = vpop.permute.xlu1 %832  ;;  %v977_v18 = vld [vmem:[%s2261_s18 + $0x58] sm:$0xff] (%p2090_p13) }
 0x233   : > { %v780_v62 = vpop.permute.xlu0 %779  ;;  %1447 = vst.msk [vmem:[%s2261_s18 + $0x78] sm:$0xff] %vm699_vm0, %v833_v60  ;;  %v967_v14 = vld [vmem:[%s2261_s18 + $0x30] sm:$0xff] (%p2090_p13) }
 0x234   : > { %1434 = vst.msk [vmem:[%s2261_s18 + $0x50] sm:$0xff] %vm699_vm0, %v780_v62 }
 0x235   : > { %968 = vst [vmem:[%s896_s6 + $0x50] sm:$0xff] (%p2090_p13), %v967_v14 }
 0x236   : > { %978 = vst [vmem:[%s896_s6 + $0x98] sm:$0xff] (%p2090_p13), %v977_v18 }
 0x23a   : > { %v863_v63 = vpop.permute.xlu1 %862  ;;  %v985_v25 = vld [vmem:[%s2261_s18 + $0x78] sm:$0xff] (%p2090_p13) }
 0x23b   : > { %v831_v0 = vpop.permute.xlu0 %830  ;;  %1453 = vst.msk [vmem:[%s2183_s21 + $0x68] sm:$0xff] %vm699_vm0, %v863_v63  ;;  %v975_v17 = vld [vmem:[%s2261_s18 + $0x50] sm:$0xff] (%p2090_p13) }
 0x23c   : > { %1446 = vst.msk [vmem:[%s2261_s18 + $0x70] sm:$0xff] %vm699_vm0, %v831_v0 }
 0x23d   : > { %976 = vst [vmem:[%s896_s6 + $0x90] sm:$0xff] (%p2090_p13), %v975_v17 }
 0x23e   : > { %986 = vst [vmem:[%s896_s6 + $0xd8] sm:$0xff] (%p2090_p13), %v985_v25 }
 0x240   : > { %891 = sbr.rel (!%p2090_p13) target bundleno = 582 (0x246), region = 64 }
 0x243   : > { %v867_v1 = vpop.permute.xlu0 %866  ;;  %v983_v23 = vld [vmem:[%s2261_s18 + $0x70] sm:$0xff] (%p2090_p13) }
 0x244   : > { %1455 = vst.msk [vmem:[%s2183_s21 + $0x78] sm:$0xff] %vm699_vm0, %v867_v1 }
 0x245   : > { %984 = vst [vmem:[%s896_s6 + $0xd0] sm:$0xff] %v983_v23 }
 0x246 PF: > { %992 = sbr.rel (!%p2090_p13) target bundleno = 609 (0x261), region = 102  ;;  %s2562_s22 = sld [smem:[#allocation18_spill]] (%p2090_p13)  ;;  %v1056_v26 = vld [vmem:[%s2271_s13] sm:$0xff] (%p2090_p13)  ;;  %v1058_v27 = vld [vmem:[%s2271_s13 + $0x8] sm:$0xff] (%p2090_p13)  ;;  %v1060_v28 = vld [vmem:[%s2271_s13 + $0x10] sm:$0xff] (%p2090_p13) }
 0x247   : > { %s2563_s17 = sld [smem:[#allocation19_spill]] (%p2090_p13)  ;;  %v1062_v61 = vld [vmem:[%s2271_s13 + $0x18] sm:$0xff] (%p2090_p13)  ;;  %v1064_v19 = vld [vmem:[%s2271_s13 + $0x20] sm:$0xff] (%p2090_p13)  ;;  %v1066_v29 = vld [vmem:[%s2271_s13 + $0x28] sm:$0xff] (%p2090_p13) }
 0x248   : > { %s2564_s24 = sld [smem:[#allocation30_spill]] (%p2090_p13)  ;;  %v1068_v30 = vld [vmem:[%s2271_s13 + $0x30] sm:$0xff] (%p2090_p13)  ;;  %v1070_v21 = vld [vmem:[%s2271_s13 + $0x38] sm:$0xff] (%p2090_p13)  ;;  %v1072_v31 = vld [vmem:[%s2271_s13 + $0x40] sm:$0xff] (%p2090_p13) }
 0x249   : > { %v1074_v32 = vld [vmem:[%s2271_s13 + $0x48] sm:$0xff] (%p2090_p13)  ;;  %v1076_v33 = vld [vmem:[%s2271_s13 + $0x50] sm:$0xff] (%p2090_p13)  ;;  %v1078_v34 = vld [vmem:[%s2271_s13 + $0x58] sm:$0xff] (%p2090_p13) }
 0x24a   : > { %v1080_v35 = vld [vmem:[%s2271_s13 + $0x60] sm:$0xff] (%p2090_p13)  ;;  %v1082_v12 = vld [vmem:[%s2271_s13 + $0x68] sm:$0xff] (%p2090_p13)  ;;  %v1084_v3 = vld [vmem:[%s2271_s13 + $0x70] sm:$0xff] (%p2090_p13) }
 0x24b   : > { %v1086_v36 = vld [vmem:[%s2271_s13 + $0x78] sm:$0xff] }
 0x24c   : > { %s1462_s12 = sshll.u32 %s2562_s22, 2 }
 0x24d   : > { %s1463_s5 = sshll.u32 %s2563_s17, 5 }
 0x24e   : > { %s995_s30 = sadd.s32 %s1463_s5, %s1462_s12 }
 0x24f   : > { %s1464_s1 = sshll.u32 %s995_s30, 3 }
 0x250   : > { %s997_s18 = scalar_lea.vmem %s2564_s24, %s1464_s1 }
 0x251   : > { %1057 = vst [vmem:[%s997_s18] sm:$0xff] %v1056_v26 }
 0x252   : > { %1059 = vst [vmem:[%s997_s18 + $0x8] sm:$0xff] %v1058_v27 }
 0x253   : > { %1061 = vst [vmem:[%s997_s18 + $0x10] sm:$0xff] %v1060_v28 }
 0x254   : > { %1063 = vst [vmem:[%s997_s18 + $0x18] sm:$0xff] %v1062_v61 }
 0x255   : > { %1065 = vst [vmem:[%s997_s18 + $0x40] sm:$0xff] %v1064_v19 }
 0x256   : > { %1067 = vst [vmem:[%s997_s18 + $0x48] sm:$0xff] %v1066_v29 }
 0x257   : > { %1069 = vst [vmem:[%s997_s18 + $0x50] sm:$0xff] %v1068_v30 }
 0x258   : > { %1071 = vst [vmem:[%s997_s18 + $0x58] sm:$0xff] %v1070_v21 }
 0x259   : > { %1073 = vst [vmem:[%s997_s18 + $0x80] sm:$0xff] %v1072_v31 }
 0x25a   : > { %1075 = vst [vmem:[%s997_s18 + $0x88] sm:$0xff] %v1074_v32 }
 0x25b   : > { %1077 = vst [vmem:[%s997_s18 + $0x90] sm:$0xff] %v1076_v33 }
 0x25c   : > { %1079 = vst [vmem:[%s997_s18 + $0x98] sm:$0xff] %v1078_v34 }
 0x25d   : > { %1081 = vst [vmem:[%s997_s18 + $0xc0] sm:$0xff] %v1080_v35 }
 0x25e   : > { %1083 = vst [vmem:[%s997_s18 + $0xc8] sm:$0xff] %v1082_v12 }
 0x25f   : > { %1085 = vst [vmem:[%s997_s18 + $0xd0] sm:$0xff] %v1084_v3 }
 0x260   : > { %1087 = vst [vmem:[%s997_s18 + $0xd8] sm:$0xff] %v1086_v36 }
 0x261 PF: > { %1093 = sbr.rel (!%p2090_p13) target bundleno = 636 (0x27c), region = 140  ;;  %s2566_s19 = sld [smem:[#allocation18_spill]] (%p2090_p13)  ;;  %v1157_v37 = vld [vmem:[%s2183_s21] sm:$0xff] (%p2090_p13)  ;;  %v1159_v38 = vld [vmem:[%s2183_s21 + $0x8] sm:$0xff] (%p2090_p13)  ;;  %v1161_v39 = vld [vmem:[%s2183_s21 + $0x10] sm:$0xff] (%p2090_p13) }
 0x262   : > { %s2567_s23 = sld [smem:[#allocation19_spill]] (%p2090_p13)  ;;  %v1163_v13 = vld [vmem:[%s2183_s21 + $0x18] sm:$0xff] (%p2090_p13)  ;;  %v1165_v40 = vld [vmem:[%s2183_s21 + $0x20] sm:$0xff] (%p2090_p13)  ;;  %v1167_v41 = vld [vmem:[%s2183_s21 + $0x28] sm:$0xff] (%p2090_p13) }
 0x263   : > { %s2568_s16 = sld [smem:[#allocation31_spill]] (%p2090_p13)  ;;  %v1169_v6 = vld [vmem:[%s2183_s21 + $0x30] sm:$0xff] (%p2090_p13)  ;;  %v1171_v9 = vld [vmem:[%s2183_s21 + $0x38] sm:$0xff] (%p2090_p13)  ;;  %v1173_v42 = vld [vmem:[%s2183_s21 + $0x40] sm:$0xff] (%p2090_p13) }
 0x264   : > { %v1175_v24 = vld [vmem:[%s2183_s21 + $0x48] sm:$0xff] (%p2090_p13)  ;;  %v1177_v43 = vld [vmem:[%s2183_s21 + $0x50] sm:$0xff] (%p2090_p13)  ;;  %v1179_v44 = vld [vmem:[%s2183_s21 + $0x58] sm:$0xff] (%p2090_p13) }
 0x265   : > { %v1181_v45 = vld [vmem:[%s2183_s21 + $0x60] sm:$0xff] (%p2090_p13)  ;;  %v1183_v46 = vld [vmem:[%s2183_s21 + $0x68] sm:$0xff] (%p2090_p13)  ;;  %v1185_v47 = vld [vmem:[%s2183_s21 + $0x70] sm:$0xff] (%p2090_p13) }
 0x266   : > { %v1187_v48 = vld [vmem:[%s2183_s21 + $0x78] sm:$0xff] }
 0x267   : > { %s1465_s4 = sshll.u32 %s2566_s19, 2 }
 0x268   : > { %s1466_s25 = sshll.u32 %s2567_s23, 5 }
 0x269   : > { %s1096_s13 = sadd.s32 %s1466_s25, %s1465_s4 }
 0x26a   : > { %s1467_s26 = sshll.u32 %s1096_s13, 3 }
 0x26b   : > { %s1098_s14 = scalar_lea.vmem %s2568_s16, %s1467_s26 }
 0x26c   : > { %1158 = vst [vmem:[%s1098_s14] sm:$0xff] %v1157_v37 }
 0x26d   : > { %1160 = vst [vmem:[%s1098_s14 + $0x8] sm:$0xff] %v1159_v38 }
 0x26e   : > { %1162 = vst [vmem:[%s1098_s14 + $0x10] sm:$0xff] %v1161_v39 }
 0x26f   : > { %1164 = vst [vmem:[%s1098_s14 + $0x18] sm:$0xff] %v1163_v13 }
 0x270   : > { %1166 = vst [vmem:[%s1098_s14 + $0x40] sm:$0xff] %v1165_v40 }
 0x271   : > { %1168 = vst [vmem:[%s1098_s14 + $0x48] sm:$0xff] %v1167_v41 }
 0x272   : > { %1170 = vst [vmem:[%s1098_s14 + $0x50] sm:$0xff] %v1169_v6 }
 0x273   : > { %1172 = vst [vmem:[%s1098_s14 + $0x58] sm:$0xff] %v1171_v9 }
 0x274   : > { %1174 = vst [vmem:[%s1098_s14 + $0x80] sm:$0xff] %v1173_v42 }
 0x275   : > { %1176 = vst [vmem:[%s1098_s14 + $0x88] sm:$0xff] %v1175_v24 }
 0x276   : > { %1178 = vst [vmem:[%s1098_s14 + $0x90] sm:$0xff] %v1177_v43 }
 0x277   : > { %1180 = vst [vmem:[%s1098_s14 + $0x98] sm:$0xff] %v1179_v44 }
 0x278   : > { %1182 = vst [vmem:[%s1098_s14 + $0xc0] sm:$0xff] %v1181_v45 }
 0x279   : > { %1184 = vst [vmem:[%s1098_s14 + $0xc8] sm:$0xff] %v1183_v46 }
 0x27a   : > { %1186 = vst [vmem:[%s1098_s14 + $0xd0] sm:$0xff] %v1185_v47 }
 0x27b   : > { %1188 = vst [vmem:[%s1098_s14 + $0xd8] sm:$0xff] %v1187_v48 }
 0x27c PF: > { %s25_s11 = sadd.s32 1, %s1871_s11   ;;  %s2569_s24 = sld [smem:[#allocation16_spill]] }
 0x27d   : > { %p22_p1 = scmp.ge.s32.totalorder %s25_s11, 6   ;;  %s2570_s25 = sld [smem:[#allocation17_spill]] }
 0x27e   : > { %s2571_s26 = sld [smem:[#allocation22_spill]]  ;;  %s2574_s27 = smov %s1847_s28 }
 0x27f   : > { %s2572_s6 = sld [smem:[#allocation20_spill]]  ;;  %s2575_s28 = smov %s1851_s29 }
 0x280   : > { %s2573_s7 = sld [smem:[#allocation24_spill]]  ;;  %s2576_s29 = smov %s2109_s20 }
 0x281   : > { %s2577_s30 = smov %s1863_s9  ;;  %s2578_s8 = smov %s1867_s10 }
 0x282   :  { %24 = sbr.rel (!%p22_p1) target bundleno = 18 (0x12), region = 259 }
 0x285   : > { %s2579_s9 = smov %s2572_s6 }
 0x286   : > { %s2580_s10 = smov %s2573_s7 }
 0x287   :  { %1218 = vsyncpa [#allocation3], 1 }
 0x288   :  { %1220 = vsyncpa [#allocation3 + $0x1], 1 }
 0x289   :  { %1221 = vsyncpa [#allocation5], 1 }
 0x28a   :  { %1222 = vsyncpa [#allocation8], 1 }
 0x28b   :  { %1224 = vsyncpa [#allocation8 + $0x1], 1 }

</bundles_post_ra>
